<compile_context>
chip_gen: v6e
topology: v6e:2x2x1
jax: 0.10.0
libtpu: 0.0.40
codegen_flags: <defaults>
</compile_context>

<pallas_src>
import math
import functools

import jax
import jax.numpy as jnp
from jax import lax
from jax.experimental import pallas as pl
from jax.experimental.pallas import tpu as pltpu


def _attn_kernel(q_ref, out_ref, attn_ref, *, scale):
    # q_ref block: (Nblk, S, D); k == v == q.
    q = q_ref[...].astype(jnp.float32)

    # qk[n, s, t] = (sum_d q[n, s, d] * q[n, t, d]) * scale
    # Batched dot_general contracting the last dim of BOTH operands: the MXU
    # consumes the same q tile twice, no explicit transpose is materialized.
    qk = lax.dot_general(
        q, q,
        dimension_numbers=(((2,), (2,)), ((0,), (0,))),
        preferred_element_type=jnp.float32,
    ) * scale
    # NOTE: the module's attn_mask is a constant -10000 everywhere and
    # softmax(x + const) == softmax(x), so it is intentionally NOT added here.

    # Numerically-stable softmax along the last axis.
    m = jnp.max(qk, axis=-1, keepdims=True)
    e = jnp.exp(qk - m)
    denom = jnp.sum(e, axis=-1, keepdims=True)
    # EUP approximate reciprocal: moves the divide off the VALU slot.
    attn = e * pl.reciprocal(denom, approx=True)

    # output[n] = attn[n] @ v[n]  (v == q), batched over heads.
    out = lax.dot_general(
        attn, q,
        dimension_numbers=(((2,), (1,)), ((0,), (0,))),
        preferred_element_type=jnp.float32,
    )

    attn_ref[...] = attn.astype(attn_ref.dtype)
    out_ref[...] = out.astype(out_ref.dtype)


def model_forward(q):
    """q: [B, H1, H2, S, D] -> (output, attn_weight, attn_mask)."""
    B, H1, H2, S, D = q.shape
    N = B * H1 * H2

    # attn_mask = -10000 * (strict-upper + lower-incl-diag) == -10000 everywhere.
    # Computed wrapper-side only because the module returns it; it has no
    # effect on the softmax (constant shift).
    ones = jnp.ones((H1, H2, S, S), dtype=q.dtype)
    attn_mask = -10000.0 * (jnp.triu(ones, k=1) + jnp.tril(ones))

    # Merge the three batch/head axes (free row-major reshape).  The whole
    # problem fits easily in VMEM, so use a 2-point "parallel" grid: the two
    # halves split across the two TensorCores on v7x; on v5e/v6e (1 TC) the
    # second step is a single cheap sequential iteration.
    q_m = q.reshape(N, S, D)
    num_blocks = 2 if N % 2 == 0 else 1
    nblk = N // num_blocks

    kernel = functools.partial(_attn_kernel, scale=1.0 / math.sqrt(D))

    out_shapes = (
        jax.ShapeDtypeStruct((N, S, D), q.dtype),   # output
        jax.ShapeDtypeStruct((N, S, S), q.dtype),   # attn_weight
    )

    grid_spec = pltpu.PrefetchScalarGridSpec(
        num_scalar_prefetch=0,
        grid=(num_blocks,),
        in_specs=[pl.BlockSpec((nblk, S, D), lambda g: (g, 0, 0))],
        out_specs=[
            pl.BlockSpec((nblk, S, D), lambda g: (g, 0, 0)),
            pl.BlockSpec((nblk, S, S), lambda g: (g, 0, 0)),
        ],
    )

    output_m, attn_m = pl.pallas_call(
        kernel,
        out_shape=out_shapes,
        grid_spec=grid_spec,
        compiler_params=pltpu.CompilerParams(
            dimension_semantics=("parallel",)),
    )(q_m)

    output = output_m.reshape(B, H1, H2, S, D)
    attn_weight = attn_m.reshape(B, H1, H2, S, S)
    return output, attn_weight, attn_mask


if __name__ == "__main__":
    B, H1, H2, S, D = 2, 2, 2, 64, 64

    key = jax.random.PRNGKey(0)
    kq, kl = jax.random.split(key)
    # Deterministic "parameter" (stands in for torch.nn.Parameter(torch.randn(...)))
    q_param = jax.random.normal(kq, (B, H1, H2, S, D), dtype=jnp.float32)
    # The module's l1 input (unused by the forward outputs, see TODO above)
    l1 = jax.random.normal(kl, (2, H1, S, D), dtype=jnp.float32)

    output, attn_weight, attn_mask = model_forward(q_param)
    jax.block_until_ready((output, attn_weight, attn_mask))

    # Reference check in plain JAX (mask included explicitly — it is a no-op).
    qk_ref = (jnp.einsum("bijsd,bijtd->bijst", q_param, q_param) / math.sqrt(D)
              + attn_mask[None])
    attn_ref = jax.nn.softmax(qk_ref, axis=-1)
    out_ref = jnp.einsum("bijst,bijtd->bijsd", attn_ref, q_param)

    # Tolerances accommodate the EUP approximate reciprocal in the softmax
    # normalization (~2^-12 relative error).
    assert jnp.allclose(attn_weight, attn_ref, atol=5e-3), "attn mismatch"
    assert jnp.allclose(output, out_ref, atol=2e-2), "output mismatch"
    assert jnp.allclose(attn_mask, jnp.full_like(attn_mask, -10000.0)), "mask mismatch"

    print("KERNEL_OK")
</pallas_src>

<mosaic_0001>
module attributes {stable_mosaic.version = 11 : i64} {
  func.func @_attn_kernel(%arg0: i32, %arg1: memref<4x64x64xf32, #tpu.memory_space<vmem>>, %arg2: memref<4x64x64xf32, #tpu.memory_space<vmem>>, %arg3: memref<4x64x64xf32, #tpu.memory_space<vmem>>) attributes {dimension_semantics = [#tpu.dimension_semantics<parallel>], iteration_bounds = array<i64: 2>, scalar_prefetch = 0 : i64, scratch_operands = 0 : i64, tpu.core_type = #tpu.core_type<tc>, window_params = [{transform_indices = @transform_0, window_bounds = array<i64: 4, 64, 64>}, {transform_indices = @transform_1, window_bounds = array<i64: 4, 64, 64>}, {transform_indices = @transform_2, window_bounds = array<i64: 4, 64, 64>}]} {
    %c0 = arith.constant 0 : index
    %c0_0 = arith.constant 0 : index
    %c0_1 = arith.constant 0 : index
    %0 = vector.load %arg1[%c0, %c0_0, %c0_1] : memref<4x64x64xf32, #tpu.memory_space<vmem>>, vector<4x64x64xf32>
    %cst = arith.constant dense<0.000000e+00> : vector<4x64x64xf32>
    %1 = tpu.matmul %0, %0, %cst {dimension_numbers = #tpu.dot_dimension_numbers<[2], [2], [1], [1], [0, 0, 0, 1, 1, 1], [0], [0]>} : vector<4x64x64xf32>, vector<4x64x64xf32>, vector<4x64x64xf32> -> vector<4x64x64xf32>
    %cst_2 = arith.constant 1.250000e-01 : f32
    %2 = vector.broadcast %cst_2 : f32 to vector<4x64x64xf32>
    %3 = arith.mulf %1, %2 : vector<4x64x64xf32>
    %cst_3 = arith.constant dense<0xFF800000> : vector<4x64xf32>
    %4 = vector.multi_reduction <maximumf>, %3, %cst_3 [2] : vector<4x64x64xf32> to vector<4x64xf32>
    %5 = vector.shape_cast %4 : vector<4x64xf32> to vector<4x64x1xf32>
    %6 = vector.broadcast %5 : vector<4x64x1xf32> to vector<4x64x64xf32>
    %7 = arith.subf %3, %6 : vector<4x64x64xf32>
    %8 = math.exp %7 : vector<4x64x64xf32>
    %cst_4 = arith.constant dense<0.000000e+00> : vector<4x64xf32>
    %9 = vector.multi_reduction <add>, %8, %cst_4 [2] : vector<4x64x64xf32> to vector<4x64xf32>
    %10 = vector.shape_cast %9 : vector<4x64xf32> to vector<4x64x1xf32>
    %11 = tpu.reciprocal %10 {approx = true} : vector<4x64x1xf32> -> vector<4x64x1xf32>
    %12 = vector.broadcast %11 : vector<4x64x1xf32> to vector<4x64x64xf32>
    %13 = arith.mulf %8, %12 : vector<4x64x64xf32>
    %cst_5 = arith.constant dense<0.000000e+00> : vector<4x64x64xf32>
    %14 = tpu.matmul %13, %0, %cst_5 {dimension_numbers = #tpu.dot_dimension_numbers<[2], [1], [1], [2], [0, 0, 0, 1, 1, 2], [0], [0]>} : vector<4x64x64xf32>, vector<4x64x64xf32>, vector<4x64x64xf32> -> vector<4x64x64xf32>
    %c0_6 = arith.constant 0 : index
    %c0_7 = arith.constant 0 : index
    %c0_8 = arith.constant 0 : index
    %15 = vector.load %arg3[%c0_6, %c0_7, %c0_8] : memref<4x64x64xf32, #tpu.memory_space<vmem>>, vector<4x64x64xf32>
    tpu.vector_store %arg3[%c0_6, %c0_7, %c0_8], %13 {strides = array<i32>} : memref<4x64x64xf32, #tpu.memory_space<vmem>>, vector<4x64x64xf32>,
    %c0_9 = arith.constant 0 : index
    %c0_10 = arith.constant 0 : index
    %c0_11 = arith.constant 0 : index
    %16 = vector.load %arg2[%c0_9, %c0_10, %c0_11] : memref<4x64x64xf32, #tpu.memory_space<vmem>>, vector<4x64x64xf32>
    tpu.vector_store %arg2[%c0_9, %c0_10, %c0_11], %14 {strides = array<i32>} : memref<4x64x64xf32, #tpu.memory_space<vmem>>, vector<4x64x64xf32>,
    return
  }
  func.func @transform_0(%arg0: i32) -> (i32, i32, i32) {
    %c0_i32 = arith.constant 0 : i32
    %c0_i32_0 = arith.constant 0 : i32
    %c0_i32_1 = arith.constant 0 : i32
    return %arg0, %c0_i32, %c0_i32_0 : i32, i32, i32
  }
  func.func @transform_1(%arg0: i32) -> (i32, i32, i32) {
    %c0_i32 = arith.constant 0 : i32
    %c0_i32_0 = arith.constant 0 : i32
    %c0_i32_1 = arith.constant 0 : i32
    return %arg0, %c0_i32, %c0_i32_0 : i32, i32, i32
  }
  func.func @transform_2(%arg0: i32) -> (i32, i32, i32) {
    %c0_i32 = arith.constant 0 : i32
    %c0_i32_0 = arith.constant 0 : i32
    %c0_i32_1 = arith.constant 0 : i32
    return %arg0, %c0_i32, %c0_i32_0 : i32, i32, i32
  }
}

</mosaic_0001>

<bundles_post_ra>
// kernel: tpu_custom_call.1
= control target key start
LH: loop header
LB: loop body
LE: loop exit
PB: predicated region body
PF: predicated region fallthrough
CT: control target
= control target key end

     0   :  { %8 = vsyncpa [#allocation3], 0  ;;  %s3646_s0 = inlined_call_operand.hbm [shape: f32[8,64,64], index: 0, kind: input, shape index: {}]   ;;  %s3647_s1 = inlined_call_operand.hbm [shape: f32[8,64,64], index: 1, kind: output, shape index: {0}]   ;;  %s3648_s2 = inlined_call_operand.hbm [shape: f32[8,64,64], index: 2, kind: output, shape index: {1}]  }
   0x1   :  { %10 = vsyncpa [#allocation3 + $0x1], 0 }
   0x2   :  { %11 = vsyncpa [#allocation4], 0 }
   0x3   :  { %13 = vsyncpa [#allocation4 + $0x1], 0 }
   0x4   :  { %14 = vsyncpa [#allocation7], 0 }
   0x5   :  { %16 = vsyncpa [#allocation7 + $0x1], 0  ;;  %s2647_s9 = smov 0   ;;  %s2649_s10 = smov 0  }
   0x6   :  { %s2651_s11 = smov 0   ;;  %s2653_s12 = smov 0  }
   0x7 LB: > { %s2668_s13 = sadd.s32 4294967295, %s2623_s12   ;;  %s1832_s14 = sadd.s32 4294967294, %s2623_s12   ;;  %s2623_s12 = sphi %s2653_s12, %s3663_s12   ;;  %s2619_s11 = sphi %s2651_s11, %s3662_s11   ;;  %s2615_s10 = sphi %s2649_s10, %s3661_s10   ;;  %s2611_s9 = sphi %s2647_s9, %s3660_s9  }
   0x8   : > { %s2672_s15 = sadd.s32 1, %s2623_s12   ;;  %s29_s16 = sadd.s32 1, %s2619_s11 }
   0x9   : > { %s26_s17 = ssub.s32 %s2623_s12, %s2672_s15  ;;  %p36_p0 = scmp.ne.s32.totalorder %s2619_s11, %s2615_s10 }
   0xa   : > { %p27_p1 = scmp.eq.s32.totalorder %s26_s17, 0  ;;  %p37_p2 = scmp.eq.s32.totalorder %s2623_s12, 0 }
   0xb   : > { %p42_p3 = scmp.ne.s32.totalorder %s2615_s10, %s2611_s9  ;;  %p43_p4 = scmp.eq.s32.totalorder %s2668_s13, 0 }
   0xc   : > { %s2684_s18 = scalar_select %p27_p1, %s2619_s11, %s29_s16  }
   0xd   : > { %p2686_p5 = por %p37_p2, %p36_p0  ;;  %p2690_p6 = por %p43_p4, %p42_p3 }
   0xe   : > { %p66_p7 = scmp.eq.s32.totalorder %s2668_s13, 1  ;;  %p72_p8 = scmp.eq.s32.totalorder %s1832_s14, 1 }
   0xf   : > { %s3652_s20 = scalar_select %p2690_p6, 1, 0 }
  0x10   : > { %p2324_p10 = scmp.lt.s32.totalorder %s2623_s12, 2  ;;  %p2697_p11 = por %p66_p7, %p36_p0 }
  0x11   : > { %p2701_p12 = por %p72_p8, %p42_p3  ;;  %s118_s23 = sand.u32 1, %s2619_s11  }
  0x12   : > { %s3653_s21 = scalar_select %p2697_p11, 1, 0 }
  0x13   : > { %s3654_s22 = scalar_select %p2701_p12, 1, 0 }
  0x14   : > { %s1950_s24 = sshll.u32 %s2623_s12, 12  ;;  %s1835_s25 = sshll.u32 %s118_s23, 8 }
  0x15   : > { %s2710_s28 = scalar_lea.hbm %s3646_s0, %s1950_s24  ;;  %s122_s29 = scalar_lea.vmem [#allocation2], %s1835_s25 }
  0x16   : > { %s130_s30 = sshll.u32 %s122_s29, 4  ;;  %p2714_p13 = pnand %p2324_p10, %p2686_p5  ;;  %s2718_s30 = int_to_ptr.vmem [resolvable:$true] %s130_s30 }
  0x17   : > { %s2720_s4 = scalar_lea.sflag [#allocation3], %s118_s23  ;;  %s2501_s5 = scalar_lea.hbm %s2710_s28, 4096 }
  0x18   : > { %p2502_p0 = scmp.ne.s32.totalorder %s2710_s28, %s2501_s5  ;;  %p2503_p1 = pneg %p2714_p13 }
  0x19   : > { %s2506_s8 = scalar_lea.hbm %s3646_s0, 8192  ;;  %p2507_p4 = scmp.lt.s32.totalorder %s2710_s28, %s3646_s0 }
  0x1a   : > { %p2504_p2 = pnand %p2503_p1, %p2502_p0  ;;  %p2508_p5 = scmp.lt.s32.totalorder %s2506_s8, %s2501_s5 }
  0x1c   : > { %p2505_p3 = pneg %p2504_p2  ;;  %p2509_p7 = por %p2508_p5, %p2507_p4 }
  0x1e   : > { %p2510_p8 = pnand %p2509_p7, %p2505_p3 }
  0x20   : > { %2513 = shalt.err (!%p2510_p8)
}
  0x21   : > { %s2514_s17 = scalar_lea.vmem %s2718_s30, 4096  ;;  %s2625_s19 = smov [#allocation2]  }
  0x22   : > { %p2515_p10 = scmp.ne.s32.totalorder %s2718_s30, %s2514_s17  ;;  %s2519_s23 = sshll.u32 %s2625_s19, 4  ;;  %s2520_s23 = int_to_ptr.vmem [resolvable:$false] %s2519_s23 }
  0x23   : > { %s2521_s24 = scalar_lea.vmem %s2520_s23, 8192  ;;  %p2522_p2 = scmp.lt.s32.totalorder %s2718_s30, %s2520_s23 }
  0x24   : > { %p2517_p9 = pnand %p2515_p10, %p2503_p1  ;;  %p2523_p12 = scmp.lt.s32.totalorder %s2521_s24, %s2514_s17 }
  0x26   : > { %p2518_p0 = pneg %p2517_p9  ;;  %p2524_p11 = por %p2523_p12, %p2522_p2 }
  0x28   : > { %p2525_p6 = pnand %p2524_p11, %p2518_p0 }
  0x2a   : > { %2528 = shalt.err (!%p2525_p6)
}
  0x2b   : > { %s2626_s25 = smov 128   ;;  %s2627_s26 = smov 8  }
  0x2c   : > { %2316 = dma.hbm_to_vmem [thread:$0]  (!%p2714_p13), %s2710_s28, 4096, %s2718_s30, %s2720_s4, %s2626_s25, %s2626_s25, %s2627_s26  }
  0x2d   : > { %p1839_p9 = scmp.ge.s32.totalorder %s2623_s12, 1  ;;  %p138_p1 = scmp.lt.s32.totalorder %s2623_s12, 3 }
  0x2f   : > { %p139_p3 = pnand %p1839_p9, %p138_p1 }
  0x30   : > { %s2744_s27 = sand.u32 (!%p139_p3), 1, %s2615_s10   ;;  %p3656_p6 = scmp.ne.s32.totalorder (!%p139_p3), %s3652_s20, 0 }
  0x31   : > { %142 = sbr.rel (%p139_p3) target bundleno = 867 (0x363), region = 24  ;;  %s2747_s29 = sshll.u32 (!%p139_p3), %s2744_s27, 8 }
  0x32   : > { %s145_s5 = scalar_lea.sflag (!%p139_p3), [#allocation3], %s2744_s27  ;;  %s2751_s6 = scalar_lea.vmem (!%p139_p3), [#allocation2], %s2747_s29 }
  0x36   : > { %2598 = dma.done.wait (%p3656_p6), %s145_s5, 4096  }
  0x37   : > { %2600 = vsyncadd (%p3656_p6), %s145_s5, 4294963200  ;;  %vm209_vm0 = vcmask 523264   ;;  %v2758_v0 = vld [vmem:[%s2751_s6 + $0x38] sm:$0xff]  ;;  %v2764_v2 = vld [vmem:[%s2751_s6 + $0x30] sm:$0xff]  ;;  %s3339_s20 = scalar_lea.vmem [#allocation6], %s2747_s29  ;;  %s1952_s28 = sshll.u32 %s2668_s13, 12 }
  0x38   : > { %v2761_v1 = vld [vmem:[%s2751_s6 + $0x78] sm:$0xff]  ;;  %2083 = vmatprep.subr.msk.mxu0 %vm209_vm0, %v2758_v0  ;;  %v2771_v3 = vld [vmem:[%s2751_s6 + $0x70] sm:$0xff]  ;;  %v2782_v4 = vld [vmem:[%s2751_s6 + $0x28] sm:$0xff]  ;;  %s3496_s4 = scalar_lea.hbm %s3648_s2, %s1952_s28  ;;  %s1727_s7 = sshll.u32 %s3339_s20, 4  ;;  %s3499_s7 = int_to_ptr.vmem [resolvable:$true] %s1727_s7 }
  0x39   : > { %2111 = vmatprep.subr.msk.mxu1 %vm209_vm0, %v2761_v1  ;;  %2084 = vmatpush3.xpose.msk.msra.mxu0 %vm209_vm0, %v2758_v0  ;;  %v2785_v5 = vld [vmem:[%s2751_s6 + $0x68] sm:$0xff]  ;;  %v2788_v6 = vld [vmem:[%s2751_s6] sm:$0xff]  ;;  %v2820_v10 = vld [vmem:[%s2751_s6 + $0x18] sm:$0xff]  ;;  %s1696_s8 = scalar_lea.sflag [#allocation7], %s2744_s27  ;;  %s2529_s14 = scalar_lea.vmem %s3499_s7, 4096 }
  0x3a   : > { %2112 = vmatpush3.xpose.msk.msra.mxu1 %vm209_vm0, %v2761_v1  ;;  %2085 = vmatprep.subr.msk.mxu0 %vm209_vm0, %v2764_v2  ;;  %v2801_v7 = vld [vmem:[%s2751_s6 + $0x40] sm:$0xff]  ;;  %v2823_v11 = vld [vmem:[%s2751_s6 + $0x58] sm:$0xff]  ;;  %v2834_v12 = vld [vmem:[%s2751_s6 + $0x10] sm:$0xff]  ;;  %p2530_p11 = scmp.ne.s32.totalorder %s3499_s7, %s2529_s14  ;;  %p3657_p12 = scmp.ne.s32.totalorder %s3653_s21, 0 }
  0x3b   : > { %2113 = vmatprep.subr.msk.mxu1 %vm209_vm0, %v2771_v3  ;;  %2099 = vmatprep.mubr.msk.f32.mxu0 %vm209_vm0, %v2788_v6  ;;  %v2804_v8 = vld [vmem:[%s2751_s6 + $0x20] sm:$0xff]  ;;  %v2837_v13 = vld [vmem:[%s2751_s6 + $0x50] sm:$0xff]  ;;  %v2848_v14 = vld [vmem:[%s2751_s6 + $0x8] sm:$0xff]  ;;  %s2628_s16 = smov [#allocation6]  }
  0x3c   : > { %v2807_v9 = vld [vmem:[%s2751_s6 + $0x60] sm:$0xff]  ;;  %2127 = vmatprep.mubr.msk.f32.mxu1 %vm209_vm0, %v2801_v7  ;;  %v2851_v15 = vld [vmem:[%s2751_s6 + $0x48] sm:$0xff]  ;;  %v2870_v16 = vld [vmem:[%s2751_s6 + $0xf8] sm:$0xff]  ;;  %p2531_p13 = pnand %p2530_p11, %p3657_p12  ;;  %s2533_s17 = sshll.u32 %s2628_s16, 4  ;;  %s2534_s17 = int_to_ptr.vmem [resolvable:$false] %s2533_s17 }
  0x3d   : > { %2086 = vmatpush3.xpose.msk.msra.mxu0 %vm209_vm0, %v2764_v2  ;;  %v2873_v17 = vld [vmem:[%s2751_s6 + $0xb8] sm:$0xff]  ;;  %v2884_v18 = vld [vmem:[%s2751_s6 + $0xf0] sm:$0xff]  ;;  %v2904_v20 = vld [vmem:[%s2751_s6 + $0xe8] sm:$0xff]  ;;  %s2535_s19 = scalar_lea.vmem %s2534_s17, 8192  ;;  %p2536_p5 = scmp.lt.s32.totalorder %s3499_s7, %s2534_s17 }
  0x3e   : > { %2114 = vmatpush3.xpose.msk.msra.mxu1 %vm209_vm0, %v2771_v3  ;;  %2087 = vmatprep.subr.msk.mxu0 %vm209_vm0, %v2782_v4  ;;  %v2887_v19 = vld [vmem:[%s2751_s6 + $0xb0] sm:$0xff]  ;;  %v2909_v21 = vld [vmem:[%s2751_s6 + $0xa8] sm:$0xff]  ;;  %v205_v22 = vld [vmem:[%s2751_s6 + $0xe0] sm:$0xff]  ;;  %p2532_p4 = pneg %p2531_p13  ;;  %p2537_p7 = scmp.lt.s32.totalorder %s2535_s19, %s2529_s14 }
  0x3f   : > { %2115 = vmatprep.subr.msk.mxu1 %vm209_vm0, %v2785_v5  ;;  %v2925_v23 = vld [vmem:[%s2751_s6 + $0xa0] sm:$0xff]  ;;  %v204_v24 = vld [vmem:[%s2751_s6 + $0xd8] sm:$0xff]  ;;  %v203_v28 = vld [vmem:[%s2751_s6 + $0xd0] sm:$0xff] }
  0x40   : > { %v2944_v25 = vld [vmem:[%s2751_s6 + $0x98] sm:$0xff]  ;;  %v201_v26 = vld [vmem:[%s2751_s6 + $0xc0] sm:$0xff]  ;;  %v2964_v29 = vld [vmem:[%s2751_s6 + $0x90] sm:$0xff]  ;;  %p2538_p8 = por %p2537_p7, %p2536_p5 }
  0x41   : > { %2088 = vmatpush3.xpose.msk.msra.mxu0 %vm209_vm0, %v2782_v4  ;;  %v193_v27 = vld [vmem:[%s2751_s6 + $0x80] sm:$0xff]  ;;  %v202_v30 = vld [vmem:[%s2751_s6 + $0xc8] sm:$0xff] }
  0x42   : > { %2116 = vmatpush3.xpose.msk.msra.mxu1 %vm209_vm0, %v2785_v5  ;;  %2089 = vmatprep.subr.msk.mxu0 %vm209_vm0, %v2804_v8  ;;  %v2976_v31 = vld [vmem:[%s2751_s6 + $0x88] sm:$0xff]  ;;  %p2539_p10 = pnand %p2538_p8, %p2532_p4 }
  0x43   : > { %2117 = vmatprep.subr.msk.mxu1 %vm209_vm0, %v2807_v9 }
  0x45   : > { %2090 = vmatpush3.xpose.msk.msra.mxu0 %vm209_vm0, %v2804_v8 }
  0x46   : > { %2118 = vmatpush3.xpose.msk.msra.mxu1 %vm209_vm0, %v2807_v9  ;;  %2091 = vmatprep.subr.msk.mxu0 %vm209_vm0, %v2820_v10 }
  0x47   : > { %2119 = vmatprep.subr.msk.mxu1 %vm209_vm0, %v2823_v11 }
  0x49   : > { %2092 = vmatpush3.xpose.msk.msra.mxu0 %vm209_vm0, %v2820_v10 }
  0x4a   : > { %2120 = vmatpush3.xpose.msk.msra.mxu1 %vm209_vm0, %v2823_v11  ;;  %2093 = vmatprep.subr.msk.mxu0 %vm209_vm0, %v2834_v12 }
  0x4b   : > { %2121 = vmatprep.subr.msk.mxu1 %vm209_vm0, %v2837_v13 }
  0x4d   : > { %2094 = vmatpush3.xpose.msk.msra.mxu0 %vm209_vm0, %v2834_v12 }
  0x4e   : > { %2122 = vmatpush3.xpose.msk.msra.mxu1 %vm209_vm0, %v2837_v13  ;;  %2095 = vmatprep.subr.msk.mxu0 %vm209_vm0, %v2848_v14 }
  0x4f   : > { %2123 = vmatprep.subr.msk.mxu1 %vm209_vm0, %v2851_v15 }
  0x51   : > { %2096 = vmatpush3.xpose.msk.msra.mxu0 %vm209_vm0, %v2848_v14 }
  0x52   : > { %2124 = vmatpush3.xpose.msk.msra.mxu1 %vm209_vm0, %v2851_v15  ;;  %2097 = vmatprep.subr.msk.mxu0 %vm209_vm0, %v2788_v6 }
  0x53   : > { %2125 = vmatprep.subr.msk.mxu1 %vm209_vm0, %v2801_v7 }
  0x55   : > { %2098 = vmatpush3.xpose.msk.msra.mxu0 %vm209_vm0, %v2788_v6 }
  0x56   : > { %2126 = vmatpush3.xpose.msk.msra.mxu1 %vm209_vm0, %v2801_v7  ;;  %2139 = vmatprep.subr.msk.mxu0 %vm209_vm0, %v2873_v17 }
  0x57   : > { %2167 = vmatprep.subr.msk.mxu1 %vm209_vm0, %v2870_v16 }
  0x58   : > { %2100 = vmatmul.mubr.msk.f32.vlgmr.msra.gmra.mxu0 %vm209_vm0, %v2848_v14 }
  0x59   : > { %2128 = vmatmul.mubr.msk.f32.vlgmr.msra.gmra.mxu1 %vm209_vm0, %v2851_v15  ;;  %2140 = vmatpush3.xpose.msk.msra.mxu0 %vm209_vm0, %v2873_v17 }
  0x5a   : > { %2168 = vmatpush3.xpose.msk.msra.mxu1 %vm209_vm0, %v2870_v16  ;;  %2141 = vmatprep.subr.msk.mxu0 %vm209_vm0, %v2887_v19 }
  0x5b   : > { %2169 = vmatprep.subr.msk.mxu1 %vm209_vm0, %v2884_v18  ;;  %2130 = vmatprep.mubr.msk.f32.mxu1 %vm209_vm0, %v2837_v13 }
  0x5c   : > { %2102 = vmatprep.mubr.msk.f32.mxu0 %vm209_vm0, %v2834_v12 }
  0x5d   : > { %2131 = vmatmul.mubr.msk.f32.gmra.mxu1 %vm209_vm0, %v2823_v11  ;;  %2103 = vmatmul.mubr.msk.f32.gmra.mxu0 %vm209_vm0, %v2820_v10 }
  0x5e   : > { %2170 = vmatpush3.xpose.msk.msra.mxu1 %vm209_vm0, %v2884_v18  ;;  %2142 = vmatpush3.xpose.msk.msra.mxu0 %vm209_vm0, %v2887_v19 }
  0x5f   : > { %2171 = vmatprep.subr.msk.mxu1 %vm209_vm0, %v2904_v20  ;;  %2143 = vmatprep.subr.msk.mxu0 %vm209_vm0, %v2909_v21 }
  0x60   : > { %2133 = vmatprep.mubr.msk.f32.mxu1 %vm209_vm0, %v2807_v9  ;;  %2105 = vmatprep.mubr.msk.f32.mxu0 %vm209_vm0, %v2804_v8 }
  0x61   : > { %2134 = vmatmul.mubr.msk.f32.gmra.mxu1 %vm209_vm0, %v2785_v5  ;;  %2106 = vmatmul.mubr.msk.f32.gmra.mxu0 %vm209_vm0, %v2782_v4 }
  0x62   : > { %2172 = vmatpush3.xpose.msk.msra.mxu1 %vm209_vm0, %v2904_v20  ;;  %2144 = vmatpush3.xpose.msk.msra.mxu0 %vm209_vm0, %v2909_v21 }
  0x63   : > { %2173 = vmatprep.subr.msk.mxu1 %vm209_vm0, %v205_v22  ;;  %2145 = vmatprep.subr.msk.mxu0 %vm209_vm0, %v2925_v23 }
  0x64   : > { %2136 = vmatprep.mubr.msk.f32.mxu1 %vm209_vm0, %v2771_v3  ;;  %2108 = vmatprep.mubr.msk.f32.mxu0 %vm209_vm0, %v2764_v2 }
  0x65   : > { %2137 = vmatmul.mubr.msk.f32.gmra.mxu1 %vm209_vm0, %v2761_v1  ;;  %2109 = vmatmul.mubr.msk.f32.gmra.mxu0 %vm209_vm0, %v2758_v0 }
  0x66   : > { %2174 = vmatpush3.xpose.msk.msra.mxu1 %vm209_vm0, %v205_v22  ;;  %2146 = vmatpush3.xpose.msk.msra.mxu0 %vm209_vm0, %v2925_v23 }
  0x67   : > { %2175 = vmatprep.subr.msk.mxu1 %vm209_vm0, %v204_v24  ;;  %2147 = vmatprep.subr.msk.mxu0 %vm209_vm0, %v2944_v25 }
  0x68   : > { %2183 = vmatprep.mubr.msk.f32.mxu1 %vm209_vm0, %v201_v26  ;;  %2155 = vmatprep.mubr.msk.f32.mxu0 %vm209_vm0, %v193_v27 }
  0x6a   : > { %2176 = vmatpush3.xpose.msk.msra.mxu1 %vm209_vm0, %v204_v24  ;;  %2148 = vmatpush3.xpose.msk.msra.mxu0 %vm209_vm0, %v2944_v25 }
  0x6b   : > { %2177 = vmatprep.subr.msk.mxu1 %vm209_vm0, %v203_v28  ;;  %2149 = vmatprep.subr.msk.mxu0 %vm209_vm0, %v2964_v29 }
  0x6e   : > { %2178 = vmatpush3.xpose.msk.msra.mxu1 %vm209_vm0, %v203_v28  ;;  %2150 = vmatpush3.xpose.msk.msra.mxu0 %vm209_vm0, %v2964_v29 }
  0x6f   : > { %2179 = vmatprep.subr.msk.mxu1 %vm209_vm0, %v202_v30  ;;  %2151 = vmatprep.subr.msk.mxu0 %vm209_vm0, %v2976_v31 }
  0x72   : > { %2180 = vmatpush3.xpose.msk.msra.mxu1 %vm209_vm0, %v202_v30  ;;  %2152 = vmatpush3.xpose.msk.msra.mxu0 %vm209_vm0, %v2976_v31 }
  0x73   : > { %2181 = vmatprep.subr.msk.mxu1 %vm209_vm0, %v201_v26  ;;  %2153 = vmatprep.subr.msk.mxu0 %vm209_vm0, %v193_v27 }
  0x76   : > { %2182 = vmatpush3.xpose.msk.msra.mxu1 %vm209_vm0, %v201_v26  ;;  %2154 = vmatpush3.xpose.msk.msra.mxu0 %vm209_vm0, %v193_v27 }
  0x77   : > { %2195 = vmatprep.subr.mxu0 %v2758_v0  ;;  %2223 = vmatprep.subr.mxu1 %v2761_v1 }
  0x79   : > { %2184 = vmatmul.mubr.msk.f32.vlgmr.msra.gmra.mxu1 %vm209_vm0, %v202_v30  ;;  %2156 = vmatmul.mubr.msk.f32.vlgmr.msra.gmra.mxu0 %vm209_vm0, %v2976_v31 }
  0x7a   : > { %2186 = vmatprep.mubr.msk.f32.mxu1 %vm209_vm0, %v203_v28  ;;  %2158 = vmatprep.mubr.msk.f32.mxu0 %vm209_vm0, %v2964_v29 }
  0x7b   : > { %2196 = vmatpush3.msra.mxu0 %v2758_v0  ;;  %2224 = vmatpush3.msra.mxu1 %v2761_v1 }
  0x7c   : > { %2197 = vmatprep.subr.mxu0 %v2764_v2  ;;  %2225 = vmatprep.subr.mxu1 %v2771_v3 }
  0x7d   : > { %2187 = vmatmul.mubr.msk.f32.gmra.mxu1 %vm209_vm0, %v204_v24  ;;  %2159 = vmatmul.mubr.msk.f32.gmra.mxu0 %vm209_vm0, %v2944_v25 }
  0x7e   : > { %2189 = vmatprep.mubr.msk.f32.mxu1 %vm209_vm0, %v205_v22  ;;  %2161 = vmatprep.mubr.msk.f32.mxu0 %vm209_vm0, %v2925_v23 }
  0x7f   : > { %2198 = vmatpush3.msra.mxu0 %v2764_v2  ;;  %2226 = vmatpush3.msra.mxu1 %v2771_v3 }
  0x80   : > { %2199 = vmatprep.subr.mxu0 %v2782_v4  ;;  %2227 = vmatprep.subr.mxu1 %v2785_v5 }
  0x81   : > { %2190 = vmatmul.mubr.msk.f32.gmra.mxu1 %vm209_vm0, %v2904_v20  ;;  %2162 = vmatmul.mubr.msk.f32.gmra.mxu0 %vm209_vm0, %v2909_v21 }
  0x82   : > { %2192 = vmatprep.mubr.msk.f32.mxu1 %vm209_vm0, %v2884_v18  ;;  %2164 = vmatprep.mubr.msk.f32.mxu0 %vm209_vm0, %v2887_v19 }
  0x83   : > { %2200 = vmatpush3.msra.mxu0 %v2782_v4  ;;  %2228 = vmatpush3.msra.mxu1 %v2785_v5 }
  0x84   : > { %2201 = vmatprep.subr.mxu0 %v2804_v8  ;;  %2229 = vmatprep.subr.mxu1 %v2807_v9 }
  0x85   : > { %2193 = vmatmul.mubr.msk.f32.gmra.mxu1 %vm209_vm0, %v2870_v16  ;;  %2165 = vmatmul.mubr.msk.f32.gmra.mxu0 %vm209_vm0, %v2873_v17 }
  0x86   : > { %2202 = vmatpush3.msra.mxu0 %v2804_v8  ;;  %2230 = vmatpush3.msra.mxu1 %v2807_v9 }
  0x87   : > { %2203 = vmatprep.subr.mxu0 %v2820_v10  ;;  %2231 = vmatprep.subr.mxu1 %v2823_v11 }
  0x88   : > { %2204 = vmatpush3.msra.mxu0 %v2820_v10  ;;  %2232 = vmatpush3.msra.mxu1 %v2823_v11 }
  0x89   : > { %2205 = vmatprep.subr.mxu0 %v2834_v12  ;;  %2233 = vmatprep.subr.mxu1 %v2837_v13 }
  0x8a   : > { %2206 = vmatpush3.msra.mxu0 %v2834_v12  ;;  %2234 = vmatpush3.msra.mxu1 %v2837_v13 }
  0x8b   : > { %2207 = vmatprep.subr.mxu0 %v2848_v14  ;;  %2235 = vmatprep.subr.mxu1 %v2851_v15 }
  0x8c   : > { %2208 = vmatpush3.msra.mxu0 %v2848_v14  ;;  %2236 = vmatpush3.msra.mxu1 %v2851_v15 }
  0x8d   : > { %2209 = vmatprep.subr.mxu0 %v2788_v6  ;;  %2237 = vmatprep.subr.mxu1 %v2801_v7 }
  0x8e   : > { %2210 = vmatpush3.msra.mxu0 %v2788_v6  ;;  %2238 = vmatpush3.msra.mxu1 %v2801_v7 }
  0x8f   : > { %2251 = vmatprep.subr.mxu0 %v2873_v17  ;;  %2279 = vmatprep.subr.mxu1 %v2870_v16 }
 0x118   : > { %v2101_v32 = vpop.f32.mrf.mxu0 }
 0x119   : > { %v2129_v33 = vpop.f32.mrf.mxu1  ;;  %v3049_v34 = vmul.f32 0.125, %v2101_v32 }
 0x11a   : > { %v3051_v35 = vmul.f32 0.125, %v2129_v33  ;;  %v300_v36 = vpop.f32.mrf.mxu0 }
 0x11b   : > { %v429_v37 = vpop.f32.mrf.mxu1  ;;  %v3053_v38 = vmul.f32 0.125, %v300_v36  ;;  %v761_v39 = vsel %vm209_vm0, %v3049_v34, -inf }
 0x11c   : > { %762 = vmax.xlane.f32.xlu1 %v761_v39  ;;  %v3057_v42 = vmul.f32 0.125, %v429_v37  ;;  %v785_v45 = vsel %vm209_vm0, %v3051_v35, -inf }
 0x11d   : > { %v2132_v40 = vpop.f32.mrf.mxu1  ;;  %v2104_v41 = vpop.f32.mrf.mxu0  ;;  %v758_v43 = vsel %vm209_vm0, %v3053_v38, -inf }
 0x11e   : > { %v3061_v44 = vmul.f32 0.125, %v2132_v40  ;;  %759 = vmax.xlane.f32.xlu0 %v758_v43  ;;  %v3065_v47 = vmul.f32 0.125, %v2104_v41  ;;  %v782_v48 = vsel %vm209_vm0, %v3057_v42, -inf }
 0x11f   : > { %v439_v46 = vpop.f32.mrf.mxu1  ;;  %v310_v51 = vpop.f32.mrf.mxu0 }
 0x120   : > { %786 = vmax.xlane.f32.xlu1 %v785_v45  ;;  %v3069_v49 = vmul.f32 0.125, %v439_v46  ;;  %v791_v50 = vsel %vm209_vm0, %v3061_v44, -inf  ;;  %v767_v53 = vsel %vm209_vm0, %v3065_v47, -inf  ;;  %v3075_v55 = vmul.f32 0.125, %v310_v51 }
 0x121   : > { %v2135_v52 = vpop.f32.mrf.mxu1  ;;  %v2107_v54 = vpop.f32.mrf.mxu0 }
 0x122   : > { %783 = vmax.xlane.f32.xlu0 %v782_v48  ;;  %v3077_v56 = vmul.f32 0.125, %v2135_v52  ;;  %v788_v57 = vsel %vm209_vm0, %v3069_v49, -inf  ;;  %v3081_v59 = vmul.f32 0.125, %v2107_v54  ;;  %v764_v60 = vsel %vm209_vm0, %v3075_v55, -inf }
 0x123   : > { %v449_v58 = vpop.f32.mrf.mxu1  ;;  %v320_v63 = vpop.f32.mrf.mxu0 }
 0x124   : > { %792 = vmax.xlane.f32.xlu1 %v791_v50  ;;  %v3085_v61 = vmul.f32 0.125, %v449_v58  ;;  %v797_v62 = vsel %vm209_vm0, %v3077_v56, -inf  ;;  %v773_v1 = vsel %vm209_vm0, %v3081_v59, -inf  ;;  %v3091_v3 = vmul.f32 0.125, %v320_v63 }
 0x125   : > { %v2138_v0 = vpop.f32.mrf.mxu1  ;;  %v2110_v2 = vpop.f32.mrf.mxu0 }
 0x126   : > { %768 = vmax.xlane.f32.xlu0 %v767_v53  ;;  %v3093_v4 = vmul.f32 0.125, %v2138_v0  ;;  %v794_v5 = vsel %vm209_vm0, %v3085_v61, -inf  ;;  %v3097_v7 = vmul.f32 0.125, %v2110_v2  ;;  %v770_v8 = vsel %vm209_vm0, %v3091_v3, -inf }
 0x127   : > { %v459_v6 = vpop.f32.mrf.mxu1  ;;  %v330_v11 = vpop.f32.mrf.mxu0 }
 0x128   : > { %789 = vmax.xlane.f32.xlu1 %v788_v57  ;;  %v3101_v9 = vmul.f32 0.125, %v459_v6  ;;  %v803_v10 = vsel %vm209_vm0, %v3093_v4, -inf  ;;  %v779_v12 = vsel %vm209_vm0, %v3097_v7, -inf  ;;  %v3107_v13 = vmul.f32 0.125, %v330_v11 }
 0x12a   : > { %765 = vmax.xlane.f32.xlu0 %v764_v60  ;;  %v800_v14 = vsel %vm209_vm0, %v3101_v9, -inf  ;;  %v776_v20 = vsel %vm209_vm0, %v3107_v13, -inf }
 0x12c   : > { %798 = vmax.xlane.f32.xlu1 %v797_v62 }
 0x12e   : > { %774 = vmax.xlane.f32.xlu0 %v773_v1 }
 0x130   : > { %795 = vmax.xlane.f32.xlu1 %v794_v5 }
 0x132   : > { %771 = vmax.xlane.f32.xlu0 %v770_v8 }
 0x134   : > { %804 = vmax.xlane.f32.xlu1 %v803_v10 }
 0x136   : > { %780 = vmax.xlane.f32.xlu0 %v779_v12 }
 0x138   : > { %801 = vmax.xlane.f32.xlu1 %v800_v14 }
 0x139   : > { %v2185_v15 = vpop.f32.mrf.mxu1  ;;  %v2157_v16 = vpop.f32.mrf.mxu0 }
 0x13a   : > { %v3111_v18 = vmul.f32 0.125, %v2185_v15  ;;  %v3115_v22 = vmul.f32 0.125, %v2157_v16  ;;  %777 = vmax.xlane.f32.xlu0 %v776_v20 }
 0x13b   : > { %v687_v24 = vpop.f32.mrf.mxu1  ;;  %v558_v26 = vpop.f32.mrf.mxu0 }
 0x13c   : > { %v3117_v27 = vmul.f32 0.125, %v687_v24  ;;  %v833_v28 = vsel %vm209_vm0, %v3111_v18, -inf  ;;  %v809_v30 = vsel %vm209_vm0, %v3115_v22, -inf  ;;  %v3123_v36 = vmul.f32 0.125, %v558_v26 }
 0x13d   : > { %834 = vmax.xlane.f32.xlu1 %v833_v28  ;;  %v2188_v32 = vpop.f32.mrf.mxu1  ;;  %v2160_v33 = vpop.f32.mrf.mxu0 }
 0x13e   : > { %v3125_v37 = vmul.f32 0.125, %v2188_v32  ;;  %v830_v39 = vsel %vm209_vm0, %v3117_v27, -inf  ;;  %810 = vmax.xlane.f32.xlu0 %v809_v30  ;;  %v3129_v41 = vmul.f32 0.125, %v2160_v33  ;;  %v806_v46 = vsel %vm209_vm0, %v3123_v36, -inf }
 0x13f   : > { %v697_v40 = vpop.f32.mrf.mxu1  ;;  %v568_v43 = vpop.f32.mrf.mxu0 }
 0x140   : > { %v3133_v48 = vmul.f32 0.125, %v697_v40  ;;  %v839_v50 = vsel %vm209_vm0, %v3125_v37, -inf  ;;  %v815_v53 = vsel %vm209_vm0, %v3129_v41, -inf  ;;  %v3139_v54 = vmul.f32 0.125, %v568_v43 }
 0x141   : > { %831 = vmax.xlane.f32.xlu1 %v830_v39  ;;  %v2191_v45 = vpop.f32.mrf.mxu1  ;;  %v2163_v51 = vpop.f32.mrf.mxu0 }
 0x142   : > { %807 = vmax.xlane.f32.xlu0 %v806_v46  ;;  %v3141_v57 = vmul.f32 0.125, %v2191_v45  ;;  %v836_v58 = vsel %vm209_vm0, %v3133_v48, -inf  ;;  %v3145_v63 = vmul.f32 0.125, %v2163_v51  ;;  %v812_v1 = vsel %vm209_vm0, %v3139_v54, -inf }
 0x143   : > { %v707_v52 = vpop.f32.mrf.mxu1  ;;  %v578_v60 = vpop.f32.mrf.mxu0 }
 0x144   : > { %v3149_v2 = vmul.f32 0.125, %v707_v52  ;;  %v845_v5 = vsel %vm209_vm0, %v3141_v57, -inf  ;;  %v821_v8 = vsel %vm209_vm0, %v3145_v63, -inf  ;;  %v3155_v11 = vmul.f32 0.125, %v578_v60 }
 0x145   : > { %840 = vmax.xlane.f32.xlu1 %v839_v50  ;;  %v2194_v62 = vpop.f32.mrf.mxu1  ;;  %v2166_v0 = vpop.f32.mrf.mxu0 }
 0x146   : > { %816 = vmax.xlane.f32.xlu0 %v815_v53  ;;  %v842_v14 = vsel %vm209_vm0, %v3149_v2, -inf  ;;  %v818_v16 = vsel %vm209_vm0, %v3155_v11, -inf  ;;  %v3167_v24 = vmul.f32 0.125, %v2194_v62  ;;  %v3171_v28 = vmul.f32 0.125, %v2166_v0 }
 0x147   : > { %v717_v6 = vpop.f32.mrf.mxu1  ;;  %v588_v10 = vpop.f32.mrf.mxu0 }
 0x148   : > { %v3157_v12 = vmul.f32 0.125, %v717_v6  ;;  %v3161_v15 = vmul.f32 0.125, %v588_v10  ;;  %v851_v30 = vsel %vm209_vm0, %v3167_v24, -inf  ;;  %v827_v32 = vsel %vm209_vm0, %v3171_v28, -inf }
 0x149   : > { %837 = vmax.xlane.f32.xlu1 %v836_v58 }
 0x14a   : > { %813 = vmax.xlane.f32.xlu0 %v812_v1  ;;  %v848_v20 = vsel %vm209_vm0, %v3157_v12, -inf  ;;  %v824_v26 = vsel %vm209_vm0, %v3161_v15, -inf }
 0x14d   : > { %846 = vmax.xlane.f32.xlu1 %v845_v5 }
 0x14e   : > { %822 = vmax.xlane.f32.xlu0 %v821_v8 }
 0x151   : > { %843 = vmax.xlane.f32.xlu1 %v842_v14 }
 0x152   : > { %819 = vmax.xlane.f32.xlu0 %v818_v16 }
 0x155   : > { %849 = vmax.xlane.f32.xlu1 %v848_v20 }
 0x156   : > { %825 = vmax.xlane.f32.xlu0 %v824_v26 }
 0x159   : > { %852 = vmax.xlane.f32.xlu1 %v851_v30 }
 0x15a   : > { %828 = vmax.xlane.f32.xlu0 %v827_v32 }
 0x1a5   : > { %v763_v33 = vpop.xlane.xlu1 %762 }
 0x1a6   : > { %v855_v39 = vsub.f32 %v3049_v34, %v763_v33 }
 0x1a7   : > { %v760_v40 = vpop.xlane.xlu0 %759 }
 0x1a8   : > { %v888_v43 = vmul.f32 1.442695, %v855_v39  ;;  %v854_v45 = vsub.f32 %v3053_v38, %v760_v40 }
 0x1a9   : > { %v787_v46 = vpop.xlane.xlu1 %786 }
 0x1aa   : > { %2362 = vpow2.f32 %v888_v43  ;;  %v886_v50 = vmul.f32 1.442695, %v854_v45  ;;  %v863_v51 = vsub.f32 %v3051_v35, %v787_v46 }
 0x1ab   : > { %v784_v52 = vpop.xlane.xlu0 %783 }
 0x1ac   : > { %2364 = vpow2.f32 %v886_v50  ;;  %v904_v53 = vmul.f32 1.442695, %v863_v51  ;;  %v862_v58 = vsub.f32 %v3057_v42, %v784_v52 }
 0x1ad   : > { %v793_v60 = vpop.xlane.xlu1 %792 }
 0x1ae   : > { %2366 = vpow2.f32 %v904_v53  ;;  %v902_v62 = vmul.f32 1.442695, %v862_v58  ;;  %v865_v0 = vsub.f32 %v3061_v44, %v793_v60 }
 0x1af   : > { %v769_v34 = vpop.xlane.xlu0 %768 }
 0x1b0   : > { %2368 = vpow2.f32 %v902_v62  ;;  %v908_v1 = vmul.f32 1.442695, %v865_v0  ;;  %v857_v38 = vsub.f32 %v3065_v47, %v769_v34 }
 0x1b1   : > { %v790_v5 = vpop.xlane.xlu1 %789 }
 0x1b2   : > { %v892_v6 = vmul.f32 1.442695, %v857_v38  ;;  %v864_v8 = vsub.f32 %v3069_v49, %v790_v5  ;;  %2370 = vpow2.f32 %v908_v1 }
 0x1b3   : > { %v766_v35 = vpop.xlane.xlu0 %765 }
 0x1b4   : > { %2372 = vpow2.f32 %v892_v6  ;;  %v906_v10 = vmul.f32 1.442695, %v864_v8  ;;  %v856_v42 = vsub.f32 %v3075_v55, %v766_v35 }
 0x1b5   : > { %v799_v14 = vpop.xlane.xlu1 %798 }
 0x1b6   : > { %v890_v16 = vmul.f32 1.442695, %v856_v42  ;;  %v867_v20 = vsub.f32 %v3077_v56, %v799_v14  ;;  %2374 = vpow2.f32 %v906_v10 }
 0x1b7   : > { %v3186_v44 = vpop.eup %2362  ;;  %v775_v26 = vpop.xlane.xlu0 %774 }
 0x1b8   : > { %2376 = vpow2.f32 %v890_v16  ;;  %v912_v47 = vmul.f32 1.442695, %v867_v20  ;;  %v859_v30 = vsub.f32 %v3081_v59, %v775_v26  ;;  %v953_v49 = vsel %vm209_vm0, %v3186_v44, 0.0 }
 0x1b9   : > { %v3191_v32 = vpop.eup %2364  ;;  %v796_v33 = vpop.xlane.xlu1 %795  ;;  %954 = vadd.xlane.f32.xlu0 %v953_v49 }
 0x1ba   : > { %v896_v55 = vmul.f32 1.442695, %v859_v30  ;;  %v866_v39 = vsub.f32 %v3085_v61, %v796_v33  ;;  %2378 = vpow2.f32 %v912_v47  ;;  %v950_v43 = vsel %vm209_vm0, %v3191_v32, 0.0 }
 0x1bb   : > { %v3194_v40 = vpop.eup %2366  ;;  %v772_v56 = vpop.xlane.xlu0 %771 }
 0x1bc   : > { %2380 = vpow2.f32 %v896_v55  ;;  %v910_v45 = vmul.f32 1.442695, %v866_v39  ;;  %v858_v59 = vsub.f32 %v3091_v3, %v772_v56  ;;  %v977_v46 = vsel %vm209_vm0, %v3194_v40, 0.0 }
 0x1bd   : > { %v3201_v50 = vpop.eup %2368  ;;  %978 = vadd.xlane.f32.xlu1 %v977_v46  ;;  %v805_v51 = vpop.xlane.xlu1 %804  ;;  %951 = vadd.xlane.f32.xlu0 %v950_v43 }
 0x1be   : > { %v894_v61 = vmul.f32 1.442695, %v858_v59  ;;  %v869_v52 = vsub.f32 %v3093_v4, %v805_v51  ;;  %2382 = vpow2.f32 %v910_v45  ;;  %v974_v3 = vsel %vm209_vm0, %v3201_v50, 0.0 }
 0x1bf   : > { %v781_v53 = vpop.xlane.xlu0 %780  ;;  %v3204_v58 = vpop.eup %2370 }
 0x1c0   : > { %2384 = vpow2.f32 %v894_v61  ;;  %v916_v60 = vmul.f32 1.442695, %v869_v52  ;;  %v861_v62 = vsub.f32 %v3097_v7, %v781_v53  ;;  %v983_v35 = vsel %vm209_vm0, %v3204_v58, 0.0 }
 0x1c1   : > { %v3209_v0 = vpop.eup %2372  ;;  %v802_v34 = vpop.xlane.xlu1 %801  ;;  %975 = vadd.xlane.f32.xlu1 %v974_v3 }
 0x1c2   : > { %v900_v1 = vmul.f32 1.442695, %v861_v62  ;;  %v868_v38 = vsub.f32 %v3101_v9, %v802_v34  ;;  %v959_v4 = vsel %vm209_vm0, %v3209_v0, 0.0  ;;  %2386 = vpow2.f32 %v916_v60 }
 0x1c3   : > { %v778_v5 = vpop.xlane.xlu0 %777  ;;  %960 = vadd.xlane.f32.xlu0 %v959_v4  ;;  %v3214_v6 = vpop.eup %2374 }
 0x1c4   : > { %2388 = vpow2.f32 %v900_v1  ;;  %v914_v7 = vmul.f32 1.442695, %v868_v38  ;;  %v860_v8 = vsub.f32 %v3107_v13, %v778_v5  ;;  %v980_v30 = vsel %vm209_vm0, %v3214_v6, 0.0 }
 0x1c5   : > { %v3219_v10 = vpop.eup %2376  ;;  %984 = vadd.xlane.f32.xlu1 %v983_v35 }
 0x1c6   : > { %v835_v42 = vpop.xlane.xlu1 %834  ;;  %v898_v9 = vmul.f32 1.442695, %v860_v8  ;;  %v956_v16 = vsel %vm209_vm0, %v3219_v10, 0.0  ;;  %2390 = vpow2.f32 %v914_v7 }
 0x1c7   : > { %v879_v14 = vsub.f32 %v3111_v18, %v835_v42  ;;  %v811_v20 = vpop.xlane.xlu0 %810  ;;  %957 = vadd.xlane.f32.xlu0 %v956_v16  ;;  %v3224_v26 = vpop.eup %2378 }
 0x1c8   : > { %2392 = vpow2.f32 %v898_v9  ;;  %v871_v47 = vsub.f32 %v3115_v22, %v811_v20  ;;  %v989_v59 = vsel %vm209_vm0, %v3224_v26, 0.0 }
 0x1c9   : > { %v936_v13 = vmul.f32 1.442695, %v879_v14  ;;  %v3229_v49 = vpop.eup %2380  ;;  %981 = vadd.xlane.f32.xlu1 %v980_v30 }
 0x1ca   : > { %v832_v33 = vpop.xlane.xlu1 %831  ;;  %v920_v18 = vmul.f32 1.442695, %v871_v47  ;;  %v965_v39 = vsel %vm209_vm0, %v3229_v49, 0.0 }
 0x1cb   : > { %v878_v55 = vsub.f32 %v3117_v27, %v832_v33  ;;  %2394 = vpow2.f32 %v936_v13  ;;  %v808_v56 = vpop.xlane.xlu0 %807  ;;  %966 = vadd.xlane.f32.xlu0 %v965_v39  ;;  %v3234_v43 = vpop.eup %2382 }
 0x1cc   : > { %2396 = vpow2.f32 %v920_v18  ;;  %v870_v45 = vsub.f32 %v3123_v36, %v808_v56  ;;  %v986_v3 = vsel %vm209_vm0, %v3234_v43, 0.0 }
 0x1cd   : > { %v934_v22 = vmul.f32 1.442695, %v878_v55  ;;  %v3239_v46 = vpop.eup %2384  ;;  %990 = vadd.xlane.f32.xlu1 %v989_v59 }
 0x1ce   : > { %v841_v51 = vpop.xlane.xlu1 %840  ;;  %v918_v27 = vmul.f32 1.442695, %v870_v45  ;;  %v962_v52 = vsel %vm209_vm0, %v3239_v46, 0.0 }
 0x1cf   : > { %v881_v61 = vsub.f32 %v3125_v37, %v841_v51  ;;  %2398 = vpow2.f32 %v934_v22  ;;  %v817_v53 = vpop.xlane.xlu0 %816  ;;  %963 = vadd.xlane.f32.xlu0 %v962_v52  ;;  %v3244_v60 = vpop.eup %2386 }
 0x1d0   : > { %2400 = vpow2.f32 %v918_v27  ;;  %v873_v62 = vsub.f32 %v3129_v41, %v817_v53  ;;  %v995_v35 = vsel %vm209_vm0, %v3244_v60, 0.0 }
 0x1d1   : > { %v940_v36 = vmul.f32 1.442695, %v881_v61  ;;  %v3249_v34 = vpop.eup %2388  ;;  %987 = vadd.xlane.f32.xlu1 %v986_v3 }
 0x1d2   : > { %v838_v1 = vpop.xlane.xlu1 %837  ;;  %v924_v37 = vmul.f32 1.442695, %v873_v62  ;;  %v971_v4 = vsel %vm209_vm0, %v3249_v34, 0.0 }
 0x1d3   : > { %v880_v38 = vsub.f32 %v3133_v48, %v838_v1  ;;  %2402 = vpow2.f32 %v940_v36  ;;  %v814_v5 = vpop.xlane.xlu0 %813  ;;  %972 = vadd.xlane.f32.xlu0 %v971_v4  ;;  %v3254_v7 = vpop.eup %2390 }
 0x1d4   : > { %2404 = vpow2.f32 %v924_v37  ;;  %v872_v8 = vsub.f32 %v3139_v54, %v814_v5  ;;  %v992_v30 = vsel %vm209_vm0, %v3254_v7, 0.0 }
 0x1d5   : > { %v938_v41 = vmul.f32 1.442695, %v880_v38  ;;  %v3259_v42 = vpop.eup %2392  ;;  %996 = vadd.xlane.f32.xlu1 %v995_v35 }
 0x1d6   : > { %v847_v9 = vpop.xlane.xlu1 %846  ;;  %v922_v48 = vmul.f32 1.442695, %v872_v8  ;;  %v968_v16 = vsel %vm209_vm0, %v3259_v42, 0.0 }
 0x1d7   : > { %v883_v14 = vsub.f32 %v3141_v57, %v847_v9  ;;  %2406 = vpow2.f32 %v938_v41  ;;  %v823_v20 = vpop.xlane.xlu0 %822  ;;  %969 = vadd.xlane.f32.xlu0 %v968_v16 }
 0x1d8   : > { %v3264_v13 = vpop.eup %2394  ;;  %2408 = vpow2.f32 %v922_v48  ;;  %v875_v47 = vsub.f32 %v3145_v63, %v823_v20 }
 0x1d9   : > { %v944_v54 = vmul.f32 1.442695, %v883_v14  ;;  %v3269_v33 = vpop.eup %2396  ;;  %993 = vadd.xlane.f32.xlu1 %v992_v30  ;;  %v1025_v59 = vsel %vm209_vm0, %v3264_v13, 0.0 }
 0x1da   : > { %v844_v18 = vpop.xlane.xlu1 %843  ;;  %v928_v57 = vmul.f32 1.442695, %v875_v47  ;;  %v1001_v39 = vsel %vm209_vm0, %v3269_v33, 0.0 }
 0x1db   : > { %v882_v55 = vsub.f32 %v3149_v2, %v844_v18  ;;  %2410 = vpow2.f32 %v944_v54  ;;  %v820_v56 = vpop.xlane.xlu0 %819  ;;  %1002 = vadd.xlane.f32.xlu0 %v1001_v39 }
 0x1dc   : > { %v3274_v22 = vpop.eup %2398  ;;  %2412 = vpow2.f32 %v928_v57  ;;  %v874_v45 = vsub.f32 %v3155_v11, %v820_v56 }
 0x1dd   : > { %v942_v63 = vmul.f32 1.442695, %v882_v55  ;;  %v3279_v51 = vpop.eup %2400  ;;  %1026 = vadd.xlane.f32.xlu1 %v1025_v59  ;;  %v1022_v3 = vsel %vm209_vm0, %v3274_v22, 0.0 }
 0x1de   : > { %v850_v27 = vpop.xlane.xlu1 %849  ;;  %v926_v2 = vmul.f32 1.442695, %v874_v45  ;;  %v998_v52 = vsel %vm209_vm0, %v3279_v51, 0.0 }
 0x1df   : > { %v884_v61 = vsub.f32 %v3157_v12, %v850_v27  ;;  %2414 = vpow2.f32 %v942_v63  ;;  %999 = vadd.xlane.f32.xlu0 %v998_v52  ;;  %v826_v53 = vpop.xlane.xlu0 %825 }
 0x1e0   : > { %v3284_v36 = vpop.eup %2402  ;;  %2416 = vpow2.f32 %v926_v2  ;;  %v876_v62 = vsub.f32 %v3161_v15, %v826_v53 }
 0x1e1   : > { %v946_v11 = vmul.f32 1.442695, %v884_v61  ;;  %v3289_v1 = vpop.eup %2404  ;;  %1023 = vadd.xlane.f32.xlu1 %v1022_v3  ;;  %v1031_v35 = vsel %vm209_vm0, %v3284_v36, 0.0 }
 0x1e2   : > { %v853_v37 = vpop.xlane.xlu1 %852  ;;  %v930_v12 = vmul.f32 1.442695, %v876_v62  ;;  %v1007_v4 = vsel %vm209_vm0, %v3289_v1, 0.0 }
 0x1e3   : > { %v885_v38 = vsub.f32 %v3167_v24, %v853_v37  ;;  %2418 = vpow2.f32 %v946_v11  ;;  %1008 = vadd.xlane.f32.xlu0 %v1007_v4  ;;  %v829_v5 = vpop.xlane.xlu0 %828 }
 0x1e4   : > { %v3294_v41 = vpop.eup %2406  ;;  %2420 = vpow2.f32 %v930_v12  ;;  %v877_v8 = vsub.f32 %v3171_v28, %v829_v5 }
 0x1e5   : > { %v948_v15 = vmul.f32 1.442695, %v885_v38  ;;  %v3299_v9 = vpop.eup %2408  ;;  %1032 = vadd.xlane.f32.xlu1 %v1031_v35  ;;  %v1028_v16 = vsel %vm209_vm0, %v3294_v41, 0.0 }
 0x1e6   : > { %v932_v48 = vmul.f32 1.442695, %v877_v8  ;;  %v1004_v24 = vsel %vm209_vm0, %v3299_v9, 0.0 }
 0x1e7   : > { %2422 = vpow2.f32 %v948_v15  ;;  %1005 = vadd.xlane.f32.xlu0 %v1004_v24 }
 0x1e8   : > { %v3303_v14 = vpop.eup %2410  ;;  %2424 = vpow2.f32 %v932_v48 }
 0x1e9   : > { %v3307_v20 = vpop.eup %2412  ;;  %1029 = vadd.xlane.f32.xlu1 %v1028_v16  ;;  %v1037_v47 = vsel %vm209_vm0, %v3303_v14, 0.0 }
 0x1ea   : > { %v1013_v28 = vsel %vm209_vm0, %v3307_v20, 0.0 }
 0x1eb   : > { %1014 = vadd.xlane.f32.xlu0 %v1013_v28 }
 0x1ec   : > { %v3311_v54 = vpop.eup %2414 }
 0x1ed   : > { %v3315_v30 = vpop.eup %2416  ;;  %1038 = vadd.xlane.f32.xlu1 %v1037_v47  ;;  %v1034_v55 = vsel %vm209_vm0, %v3311_v54, 0.0 }
 0x1ee   : > { %v1010_v18 = vsel %vm209_vm0, %v3315_v30, 0.0 }
 0x1ef   : > { %1011 = vadd.xlane.f32.xlu0 %v1010_v18 }
 0x1f0   : > { %v3319_v57 = vpop.eup %2418 }
 0x1f1   : > { %v3323_v39 = vpop.eup %2420  ;;  %1035 = vadd.xlane.f32.xlu1 %v1034_v55  ;;  %v1040_v45 = vsel %vm209_vm0, %v3319_v57, 0.0  ;;  %v2490_v55 = vld [vmem:[%s2751_s6 + $0xf8] sm:$0xff] }
 0x1f2   : > { %v1016_v56 = vsel %vm209_vm0, %v3323_v39, 0.0 }
 0x1f3   : > { %1017 = vadd.xlane.f32.xlu0 %v1016_v56 }
 0x1f4   : > { %v3327_v63 = vpop.eup %2422 }
 0x1f5   : > { %v3331_v59 = vpop.eup %2424  ;;  %1041 = vadd.xlane.f32.xlu1 %v1040_v45  ;;  %v1043_v2 = vsel %vm209_vm0, %v3327_v63, 0.0  ;;  %v2491_v45 = vld [vmem:[%s2751_s6 + $0xf0] sm:$0xff] }
 0x1f6   : > { %v1019_v27 = vsel %vm209_vm0, %v3331_v59, 0.0 }
 0x1f7   : > { %1020 = vadd.xlane.f32.xlu0 %v1019_v27 }
 0x1f9   : > { %1044 = vadd.xlane.f32.xlu1 %v1043_v2  ;;  %v2492_v2 = vld [vmem:[%s2751_s6 + $0xe8] sm:$0xff] }
 0x242   : > { %v955_v61 = vpop.xlane.xlu0 %954 }
 0x243   : > { %2426 = vrcp.f32 %v955_v61 }
 0x246   : > { %v979_v52 = vpop.xlane.xlu1 %978  ;;  %v952_v53 = vpop.xlane.xlu0 %951 }
 0x247   : > { %2428 = vrcp.f32 %v979_v52  ;;  %v2493_v52 = vld [vmem:[%s2751_s6 + $0xe0] sm:$0xff] }
 0x248   : > { %2430 = vrcp.f32 %v952_v53 }
 0x24a   : > { %v976_v11 = vpop.xlane.xlu1 %975 }
 0x24b   : > { %2432 = vrcp.f32 %v976_v11  ;;  %v2494_v11 = vld [vmem:[%s2751_s6 + $0x98] sm:$0xff] }
 0x24c   : > { %v961_v62 = vpop.xlane.xlu0 %960 }
 0x24d   : > { %2434 = vrcp.f32 %v961_v62 }
 0x24e   : > { %v985_v3 = vpop.xlane.xlu1 %984 }
 0x24f   : > { %2436 = vrcp.f32 %v985_v3 }
 0x250   : > { %v2427_v37 = vpop.eup %2426  ;;  %v958_v12 = vpop.xlane.xlu0 %957 }
 0x251   : > { %v1079_v38 = vmul.f32 %v2427_v37, %v3186_v44  ;;  %2438 = vrcp.f32 %v958_v12 }
 0x252   : > { %v982_v4 = vpop.xlane.xlu1 %981 }
 0x253   : > { %1627 = vst.msk [vmem:[%s3339_s20 + $0x8] sm:$0xff] %vm209_vm0, %v1079_v38  ;;  %2440 = vrcp.f32 %v982_v4  ;;  %v2497_v4 = vld [vmem:[%s2751_s6 + $0x88] sm:$0xff] }
 0x254   : > { %v2429_v5 = vpop.eup %2428  ;;  %v967_v15 = vpop.xlane.xlu0 %966 }
 0x255   : > { %v2431_v8 = vpop.eup %2430  ;;  %v1087_v35 = vmul.f32 %v2429_v5, %v3194_v40  ;;  %2442 = vrcp.f32 %v967_v15 }
 0x256   : > { %v991_v48 = vpop.xlane.xlu1 %990  ;;  %v1078_v44 = vmul.f32 %v2431_v8, %v3191_v32  ;;  %v2499_v8 = vld [vmem:[%s2751_s6 + $0xc8] sm:$0xff] }
 0x257   : > { %1635 = vst.msk [vmem:[%s3339_s20 + $0x48] sm:$0xff] %vm209_vm0, %v1087_v35  ;;  %2444 = vrcp.f32 %v991_v48 }
 0x258   : > { %v2433_v24 = vpop.eup %2432  ;;  %2211 = vmatprep.mubr.msk.f32.mxu0 %vm209_vm0, %v1078_v44  ;;  %1626 = vst.msk [vmem:[%s3339_s20] sm:$0xff] %vm209_vm0, %v1078_v44  ;;  %v964_v16 = vpop.xlane.xlu0 %963 }
 0x259   : > { %2212 = vmatmul.mubr.msk.f32.vlgmr.msra.gmra.mxu0 %vm209_vm0, %v1079_v38  ;;  %2446 = vrcp.f32 %v964_v16  ;;  %v1086_v40 = vmul.f32 %v2433_v24, %v3201_v50  ;;  %v2496_v38 = vld [vmem:[%s2751_s6 + $0xd0] sm:$0xff]  ;;  %v2500_v16 = vld [vmem:[%s2751_s6 + $0xc0] sm:$0xff] }
 0x25a   : > { %v2435_v28 = vpop.eup %2434  ;;  %v988_v47 = vpop.xlane.xlu1 %987  ;;  %2252 = vmatpush3.msra.mxu0 %v2873_v17 }
 0x25b   : > { %2448 = vrcp.f32 %v988_v47  ;;  %2239 = vmatprep.mubr.msk.f32.mxu1 %vm209_vm0, %v1086_v40  ;;  %1634 = vst.msk [vmem:[%s3339_s20 + $0x40] sm:$0xff] %vm209_vm0, %v1086_v40  ;;  %v1081_v32 = vmul.f32 %v2435_v28, %v3209_v0  ;;  %2253 = vmatprep.subr.mxu0 %v2887_v19 }
 0x25c   : > { %v2437_v18 = vpop.eup %2436  ;;  %2240 = vmatmul.mubr.msk.f32.vlgmr.msra.gmra.mxu1 %vm209_vm0, %v1087_v35  ;;  %v973_v50 = vpop.xlane.xlu0 %972  ;;  %2254 = vmatpush3.msra.mxu0 %v2887_v19 }
 0x25d   : > { %2450 = vrcp.f32 %v973_v50  ;;  %1629 = vst.msk [vmem:[%s3339_s20 + $0x18] sm:$0xff] %vm209_vm0, %v1081_v32  ;;  %v1089_v17 = vmul.f32 %v2437_v18, %v3204_v58  ;;  %2280 = vmatpush3.msra.mxu1 %v2490_v55  ;;  %2255 = vmatprep.subr.mxu0 %v2909_v21 }
 0x25e   : > { %v2439_v0 = vpop.eup %2438  ;;  %v997_v56 = vpop.xlane.xlu1 %996  ;;  %2281 = vmatprep.subr.mxu1 %v2491_v45  ;;  %2256 = vmatpush3.msra.mxu0 %v2909_v21 }
 0x25f   : > { %2452 = vrcp.f32 %v997_v56  ;;  %v1080_v19 = vmul.f32 %v2439_v0, %v3219_v10  ;;  %1637 = vst.msk [vmem:[%s3339_s20 + $0x58] sm:$0xff] %vm209_vm0, %v1089_v17  ;;  %2282 = vmatpush3.msra.mxu1 %v2491_v45  ;;  %2257 = vmatprep.subr.mxu0 %v2925_v23 }
 0x260   : > { %v2441_v58 = vpop.eup %2440  ;;  %v970_v27 = vpop.xlane.xlu0 %969  ;;  %2283 = vmatprep.subr.mxu1 %v2492_v2  ;;  %2258 = vmatpush3.msra.mxu0 %v2925_v23 }
 0x261   : > { %2454 = vrcp.f32 %v970_v27  ;;  %2214 = vmatprep.mubr.msk.f32.mxu0 %vm209_vm0, %v1080_v19  ;;  %1628 = vst.msk [vmem:[%s3339_s20 + $0x10] sm:$0xff] %vm209_vm0, %v1080_v19  ;;  %v1088_v21 = vmul.f32 %v2441_v58, %v3214_v6  ;;  %2284 = vmatpush3.msra.mxu1 %v2492_v2 }
 0x262   : > { %v2443_v10 = vpop.eup %2442  ;;  %v994_v61 = vpop.xlane.xlu1 %993  ;;  %2215 = vmatmul.mubr.msk.f32.gmra.mxu0 %vm209_vm0, %v1081_v32  ;;  %2285 = vmatprep.subr.mxu1 %v2493_v52 }
 0x263   : > { %2456 = vrcp.f32 %v994_v61  ;;  %2242 = vmatprep.mubr.msk.f32.mxu1 %vm209_vm0, %v1088_v21  ;;  %1636 = vst.msk [vmem:[%s3339_s20 + $0x50] sm:$0xff] %vm209_vm0, %v1088_v21  ;;  %v1083_v23 = vmul.f32 %v2443_v10, %v3229_v49  ;;  %2259 = vmatprep.subr.mxu0 %v2944_v25  ;;  %v2495_v25 = vld [vmem:[%s2751_s6 + $0xd8] sm:$0xff] }
 0x264   : > { %v2445_v53 = vpop.eup %2444  ;;  %2243 = vmatmul.mubr.msk.f32.gmra.mxu1 %vm209_vm0, %v1089_v17  ;;  %v1003_v6 = vpop.xlane.xlu0 %1002  ;;  %2260 = vmatpush3.msra.mxu0 %v2494_v11 }
 0x265   : > { %2458 = vrcp.f32 %v1003_v6  ;;  %1631 = vst.msk [vmem:[%s3339_s20 + $0x28] sm:$0xff] %vm209_vm0, %v1083_v23  ;;  %v1091_v62 = vmul.f32 %v2445_v53, %v3224_v26  ;;  %2286 = vmatpush3.msra.mxu1 %v2493_v52  ;;  %2261 = vmatprep.subr.mxu0 %v2964_v29 }
 0x266   : > { %v2447_v49 = vpop.eup %2446  ;;  %v1027_v3 = vpop.xlane.xlu1 %1026  ;;  %2287 = vmatprep.subr.mxu1 %v2495_v25  ;;  %2262 = vmatpush3.msra.mxu0 %v2964_v29 }
 0x267   : > { %2460 = vrcp.f32 %v1027_v3  ;;  %v1082_v37 = vmul.f32 %v2447_v49, %v3239_v46  ;;  %1639 = vst.msk [vmem:[%s3339_s20 + $0x68] sm:$0xff] %vm209_vm0, %v1091_v62  ;;  %2288 = vmatpush3.msra.mxu1 %v2495_v25  ;;  %2263 = vmatprep.subr.mxu0 %v2976_v31  ;;  %v2498_v31 = vld [vmem:[%s2751_s6 + $0x80] sm:$0xff] }
 0x268   : > { %v2449_v26 = vpop.eup %2448  ;;  %v1000_v12 = vpop.xlane.xlu0 %999  ;;  %2289 = vmatprep.subr.mxu1 %v2496_v38  ;;  %2264 = vmatpush3.msra.mxu0 %v2497_v4 }
 0x269   : > { %2462 = vrcp.f32 %v1000_v12  ;;  %2217 = vmatprep.mubr.msk.f32.mxu0 %vm209_vm0, %v1082_v37  ;;  %1630 = vst.msk [vmem:[%s3339_s20 + $0x20] sm:$0xff] %vm209_vm0, %v1082_v37  ;;  %v1090_v29 = vmul.f32 %v2449_v26, %v3234_v43  ;;  %2290 = vmatpush3.msra.mxu1 %v2496_v38 }
 0x26a   : > { %v2451_v46 = vpop.eup %2450  ;;  %v1024_v5 = vpop.xlane.xlu1 %1023  ;;  %2218 = vmatmul.mubr.msk.f32.gmra.mxu0 %vm209_vm0, %v1083_v23  ;;  %2265 = vmatprep.subr.mxu0 %v2498_v31 }
 0x26b   : > { %2464 = vrcp.f32 %v1024_v5  ;;  %2245 = vmatprep.mubr.msk.f32.mxu1 %vm209_vm0, %v1090_v29  ;;  %1638 = vst.msk [vmem:[%s3339_s20 + $0x60] sm:$0xff] %vm209_vm0, %v1090_v29  ;;  %v1085_v15 = vmul.f32 %v2451_v46, %v3249_v34  ;;  %2291 = vmatprep.subr.mxu1 %v2499_v8 }
 0x26c   : > { %v2453_v43 = vpop.eup %2452  ;;  %2246 = vmatmul.mubr.msk.f32.gmra.mxu1 %vm209_vm0, %v1091_v62  ;;  %v1009_v35 = vpop.xlane.xlu0 %1008  ;;  %2266 = vmatpush3.msra.mxu0 %v2498_v31 }
 0x26d   : > { %2466 = vrcp.f32 %v1009_v35  ;;  %1633 = vst.msk [vmem:[%s3339_s20 + $0x38] sm:$0xff] %vm209_vm0, %v1085_v15  ;;  %v1093_v48 = vmul.f32 %v2453_v43, %v3244_v60  ;;  %2292 = vmatpush3.msra.mxu1 %v2499_v8 }
 0x26e   : > { %v2455_v44 = vpop.eup %2454  ;;  %v1033_v24 = vpop.xlane.xlu1 %1032  ;;  %2293 = vmatprep.subr.mxu1 %v2500_v16 }
 0x26f   : > { %2468 = vrcp.f32 %v1033_v24  ;;  %v1084_v34 = vmul.f32 %v2455_v44, %v3259_v42  ;;  %1641 = vst.msk [vmem:[%s3339_s20 + $0x78] sm:$0xff] %vm209_vm0, %v1093_v48  ;;  %2294 = vmatpush3.msra.mxu1 %v2500_v16 }
 0x270   : > { %v2457_v40 = vpop.eup %2456  ;;  %v1006_v28 = vpop.xlane.xlu0 %1005 }
 0x271   : > { %2470 = vrcp.f32 %v1006_v28  ;;  %2220 = vmatprep.mubr.msk.f32.mxu0 %vm209_vm0, %v1084_v34  ;;  %1632 = vst.msk [vmem:[%s3339_s20 + $0x30] sm:$0xff] %vm209_vm0, %v1084_v34  ;;  %v1092_v60 = vmul.f32 %v2457_v40, %v3254_v7 }
 0x272   : > { %v2459_v47 = vpop.eup %2458  ;;  %v1030_v32 = vpop.xlane.xlu1 %1029  ;;  %2221 = vmatmul.mubr.msk.f32.gmra.mxu0 %vm209_vm0, %v1085_v15 }
 0x273   : > { %v1095_v42 = vmul.f32 %v2459_v47, %v3269_v33  ;;  %2472 = vrcp.f32 %v1030_v32  ;;  %2248 = vmatprep.mubr.msk.f32.mxu1 %vm209_vm0, %v1092_v60  ;;  %1640 = vst.msk [vmem:[%s3339_s20 + $0x70] sm:$0xff] %vm209_vm0, %v1092_v60 }
 0x274   : > { %v2461_v18 = vpop.eup %2460  ;;  %2249 = vmatmul.mubr.msk.f32.gmra.mxu1 %vm209_vm0, %v1093_v48  ;;  %v1015_v50 = vpop.xlane.xlu0 %1014 }
 0x275   : > { %1643 = vst.msk [vmem:[%s3339_s20 + $0x88] sm:$0xff] %vm209_vm0, %v1095_v42  ;;  %v1103_v7 = vmul.f32 %v2461_v18, %v3264_v13  ;;  %2474 = vrcp.f32 %v1015_v50 }
 0x276   : > { %v2463_v17 = vpop.eup %2462  ;;  %v1039_v55 = vpop.xlane.xlu1 %1038 }
 0x277   : > { %1651 = vst.msk [vmem:[%s3339_s20 + $0xc8] sm:$0xff] %vm209_vm0, %v1103_v7  ;;  %2476 = vrcp.f32 %v1039_v55  ;;  %v1094_v33 = vmul.f32 %v2463_v17, %v3279_v51 }
 0x278   : > { %v2465_v0 = vpop.eup %2464  ;;  %v1012_v56 = vpop.xlane.xlu0 %1011 }
 0x279   : > { %2478 = vrcp.f32 %v1012_v56  ;;  %2267 = vmatprep.mubr.msk.f32.mxu0 %vm209_vm0, %v1094_v33  ;;  %1642 = vst.msk [vmem:[%s3339_s20 + $0x80] sm:$0xff] %vm209_vm0, %v1094_v33  ;;  %v1102_v45 = vmul.f32 %v2465_v0, %v3274_v22 }
 0x27a   : > { %v2467_v13 = vpop.eup %2466  ;;  %v1036_v19 = vpop.xlane.xlu1 %1035  ;;  %2268 = vmatmul.mubr.msk.f32.vlgmr.msra.gmra.mxu0 %vm209_vm0, %v1095_v42 }
 0x27b   : > { %2480 = vrcp.f32 %v1036_v19  ;;  %2295 = vmatprep.mubr.msk.f32.mxu1 %vm209_vm0, %v1102_v45  ;;  %1650 = vst.msk [vmem:[%s3339_s20 + $0xc0] sm:$0xff] %vm209_vm0, %v1102_v45  ;;  %v1097_v51 = vmul.f32 %v2467_v13, %v3289_v1 }
 0x27c   : > { %v2469_v58 = vpop.eup %2468  ;;  %2296 = vmatmul.mubr.msk.f32.vlgmr.msra.gmra.mxu1 %vm209_vm0, %v1103_v7  ;;  %v1018_v27 = vpop.xlane.xlu0 %1017 }
 0x27d   : > { %2482 = vrcp.f32 %v1018_v27  ;;  %1645 = vst.msk [vmem:[%s3339_s20 + $0x98] sm:$0xff] %vm209_vm0, %v1097_v51  ;;  %v1105_v22 = vmul.f32 %v2469_v58, %v3284_v36 }
 0x27e   : > { %v2471_v2 = vpop.eup %2470  ;;  %v1042_v21 = vpop.xlane.xlu1 %1041 }
 0x27f   : > { %2484 = vrcp.f32 %v1042_v21  ;;  %v1096_v10 = vmul.f32 %v2471_v2, %v3299_v9  ;;  %1653 = vst.msk [vmem:[%s3339_s20 + $0xd8] sm:$0xff] %vm209_vm0, %v1105_v22 }
 0x280   : > { %v2473_v1 = vpop.eup %2472  ;;  %v1021_v61 = vpop.xlane.xlu0 %1020 }
 0x281   : > { %2486 = vrcp.f32 %v1021_v61  ;;  %2270 = vmatprep.mubr.msk.f32.mxu0 %vm209_vm0, %v1096_v10  ;;  %1644 = vst.msk [vmem:[%s3339_s20 + $0x90] sm:$0xff] %vm209_vm0, %v1096_v10  ;;  %v1104_v52 = vmul.f32 %v2473_v1, %v3294_v41 }
 0x282   : > { %v2475_v36 = vpop.eup %2474  ;;  %v1045_v23 = vpop.xlane.xlu1 %1044  ;;  %2271 = vmatmul.mubr.msk.f32.gmra.mxu0 %vm209_vm0, %v1097_v51 }
 0x283   : > { %2488 = vrcp.f32 %v1045_v23  ;;  %2298 = vmatprep.mubr.msk.f32.mxu1 %vm209_vm0, %v1104_v52  ;;  %1652 = vst.msk [vmem:[%s3339_s20 + $0xd0] sm:$0xff] %vm209_vm0, %v1104_v52  ;;  %v1099_v9 = vmul.f32 %v2475_v36, %v3307_v20 }
 0x284   : > { %v2477_v53 = vpop.eup %2476  ;;  %2299 = vmatmul.mubr.msk.f32.gmra.mxu1 %vm209_vm0, %v1105_v22 }
 0x285   : > { %1647 = vst.msk [vmem:[%s3339_s20 + $0xa8] sm:$0xff] %vm209_vm0, %v1099_v9  ;;  %v1107_v41 = vmul.f32 %v2477_v53, %v3303_v14 }
 0x286   : > { %v2479_v6 = vpop.eup %2478 }
 0x287   : > { %v1098_v11 = vmul.f32 %v2479_v6, %v3315_v30  ;;  %1655 = vst.msk [vmem:[%s3339_s20 + $0xe8] sm:$0xff] %vm209_vm0, %v1107_v41 }
 0x288   : > { %v2481_v62 = vpop.eup %2480 }
 0x289   : > { %2273 = vmatprep.mubr.msk.f32.mxu0 %vm209_vm0, %v1098_v11  ;;  %1646 = vst.msk [vmem:[%s3339_s20 + $0xa0] sm:$0xff] %vm209_vm0, %v1098_v11  ;;  %v1106_v20 = vmul.f32 %v2481_v62, %v3311_v54 }
 0x28a   : > { %v2483_v49 = vpop.eup %2482  ;;  %2274 = vmatmul.mubr.msk.f32.gmra.mxu0 %vm209_vm0, %v1099_v9 }
 0x28b   : > { %2301 = vmatprep.mubr.msk.f32.mxu1 %vm209_vm0, %v1106_v20  ;;  %1654 = vst.msk [vmem:[%s3339_s20 + $0xe0] sm:$0xff] %vm209_vm0, %v1106_v20  ;;  %v1100_v14 = vmul.f32 %v2483_v49, %v3323_v39 }
 0x28c   : > { %v2485_v30 = vpop.eup %2484  ;;  %2302 = vmatmul.mubr.msk.f32.gmra.mxu1 %vm209_vm0, %v1107_v41 }
 0x28d   : > { %2276 = vmatprep.mubr.msk.f32.mxu0 %vm209_vm0, %v1100_v14  ;;  %1648 = vst.msk [vmem:[%s3339_s20 + $0xb0] sm:$0xff] %vm209_vm0, %v1100_v14  ;;  %v1108_v54 = vmul.f32 %v2485_v30, %v3319_v57 }
 0x28e   : > { %v2487_v3 = vpop.eup %2486 }
 0x28f   : > { %2304 = vmatprep.mubr.msk.f32.mxu1 %vm209_vm0, %v1108_v54  ;;  %1656 = vst.msk [vmem:[%s3339_s20 + $0xf0] sm:$0xff] %vm209_vm0, %v1108_v54  ;;  %v1101_v39 = vmul.f32 %v2487_v3, %v3331_v59 }
 0x290   : > { %v2489_v25 = vpop.eup %2488 }
 0x291   : > { %2277 = vmatmul.mubr.msk.f32.gmra.mxu0 %vm209_vm0, %v1101_v39  ;;  %1649 = vst.msk [vmem:[%s3339_s20 + $0xb8] sm:$0xff] %vm209_vm0, %v1101_v39  ;;  %v1109_v37 = vmul.f32 %v2489_v25, %v3327_v63 }
 0x293   : > { %2305 = vmatmul.mubr.msk.f32.gmra.mxu1 %vm209_vm0, %v1109_v37  ;;  %1657 = vst.msk [vmem:[%s3339_s20 + $0xf8] sm:$0xff] %vm209_vm0, %v1109_v37 }
 0x294   : > { %2542 = shalt.err (!%p2539_p10)
}
 0x295   : > { %s2543_s23 = scalar_lea.hbm %s3496_s4, 4096  ;;  %s2547_s26 = scalar_lea.hbm %s3648_s2, 8192 }
 0x296   : > { %p2544_p0 = scmp.ne.s32.totalorder %s3496_s4, %s2543_s23  ;;  %p2548_p1 = scmp.lt.s32.totalorder %s3496_s4, %s3648_s2 }
 0x297   : > { %p2549_p3 = scmp.lt.s32.totalorder %s2547_s26, %s2543_s23 }
 0x298   : > { %p2545_p2 = pnand %p2544_p0, %p3657_p12 }
 0x299   : > { %p2550_p6 = por %p2549_p3, %p2548_p1 }
 0x29a   : > { %p2546_p9 = pneg %p2545_p2 }
 0x29c   : > { %p2551_p11 = pnand %p2550_p6, %p2546_p9 }
 0x29e   : > { %2554 = shalt.err (!%p2551_p11)
}
 0x29f   : > { %s2629_s20 = smov 128   ;;  %s2630_s30 = smov 8  }
 0x2a0   : > { %2310 = dma.vmem_to_hbm [thread:$0]  (%p3657_p12), %s3499_s7, 4096, %s3496_s4, %s1696_s8, %s2629_s20, %s2629_s20, %s2630_s30  }
 0x2a1   : > { %s3528_s3 = scalar_lea.vmem [#allocation5], %s2747_s29  ;;  %s3598_s8 = scalar_lea.hbm %s3647_s1, %s1952_s28 }
 0x2a2   : > { %s1710_s29 = sshll.u32 %s3528_s3, 4  ;;  %s1691_s14 = scalar_lea.sflag [#allocation4], %s2744_s27  ;;  %s3600_s29 = int_to_ptr.vmem [resolvable:$true] %s1710_s29 }
 0x2a3   : > { %s2555_s16 = scalar_lea.vmem %s3600_s29, 4096  ;;  %s2631_s13 = smov [#allocation5]  }
 0x2a4   : > { %p2556_p13 = scmp.ne.s32.totalorder %s3600_s29, %s2555_s16  ;;  %s2559_s17 = sshll.u32 %s2631_s13, 4  ;;  %s2560_s17 = int_to_ptr.vmem [resolvable:$false] %s2559_s17 }
 0x2a5   : > { %s2561_s19 = scalar_lea.vmem %s2560_s17, 8192  ;;  %p2562_p7 = scmp.lt.s32.totalorder %s3600_s29, %s2560_s17 }
 0x2a6   : > { %p2557_p4 = pnand %p2556_p13, %p3657_p12  ;;  %p2563_p8 = scmp.lt.s32.totalorder %s2561_s19, %s2555_s16 }
 0x2a8   : > { %p2558_p5 = pneg %p2557_p4  ;;  %p2564_p10 = por %p2563_p8, %p2562_p7 }
 0x2aa   : > { %p2565_p0 = pnand %p2564_p10, %p2558_p5 }
 0x319   : > { %v2213_v57 = vpop.f32.mrf.mxu0 }
 0x31a   : > { %1659 = vst.msk [vmem:[%s3528_s3 + $0x8] sm:$0xff] %vm209_vm0, %v2213_v57 }
 0x31b   : > { %v1200_v63 = vpop.f32.mrf.mxu0 }
 0x31c   : > { %1658 = vst.msk [vmem:[%s3528_s3] sm:$0xff] %vm209_vm0, %v1200_v63  ;;  %v2241_v59 = vpop.f32.mrf.mxu1 }
 0x31d   : > { %1667 = vst.msk [vmem:[%s3528_s3 + $0x48] sm:$0xff] %vm209_vm0, %v2241_v59 }
 0x31e   : > { %v1329_v26 = vpop.f32.mrf.mxu1 }
 0x31f   : > { %1666 = vst.msk [vmem:[%s3528_s3 + $0x40] sm:$0xff] %vm209_vm0, %v1329_v26 }
 0x322   : > { %v2216_v12 = vpop.f32.mrf.mxu0 }
 0x323   : > { %1661 = vst.msk [vmem:[%s3528_s3 + $0x18] sm:$0xff] %vm209_vm0, %v2216_v12 }
 0x324   : > { %v1210_v38 = vpop.f32.mrf.mxu0  ;;  %v2244_v4 = vpop.f32.mrf.mxu1 }
 0x325   : > { %1660 = vst.msk [vmem:[%s3528_s3 + $0x10] sm:$0xff] %vm209_vm0, %v1210_v38  ;;  %1669 = vst.msk [vmem:[%s3528_s3 + $0x58] sm:$0xff] %vm209_vm0, %v2244_v4 }
 0x326   : > { %v1339_v29 = vpop.f32.mrf.mxu1 }
 0x327   : > { %1668 = vst.msk [vmem:[%s3528_s3 + $0x50] sm:$0xff] %vm209_vm0, %v1339_v29 }
 0x32a   : > { %v2219_v46 = vpop.f32.mrf.mxu0 }
 0x32b   : > { %1663 = vst.msk [vmem:[%s3528_s3 + $0x28] sm:$0xff] %vm209_vm0, %v2219_v46 }
 0x32c   : > { %v1220_v5 = vpop.f32.mrf.mxu0  ;;  %v2247_v31 = vpop.f32.mrf.mxu1 }
 0x32d   : > { %1662 = vst.msk [vmem:[%s3528_s3 + $0x20] sm:$0xff] %vm209_vm0, %v1220_v5  ;;  %1671 = vst.msk [vmem:[%s3528_s3 + $0x68] sm:$0xff] %vm209_vm0, %v2247_v31 }
 0x32e   : > { %v1349_v15 = vpop.f32.mrf.mxu1 }
 0x32f   : > { %1670 = vst.msk [vmem:[%s3528_s3 + $0x60] sm:$0xff] %vm209_vm0, %v1349_v15 }
 0x332   : > { %v2222_v8 = vpop.f32.mrf.mxu0 }
 0x333   : > { %1665 = vst.msk [vmem:[%s3528_s3 + $0x38] sm:$0xff] %vm209_vm0, %v2222_v8 }
 0x334   : > { %v1230_v43 = vpop.f32.mrf.mxu0  ;;  %v2250_v35 = vpop.f32.mrf.mxu1 }
 0x335   : > { %1664 = vst.msk [vmem:[%s3528_s3 + $0x30] sm:$0xff] %vm209_vm0, %v1230_v43  ;;  %1673 = vst.msk [vmem:[%s3528_s3 + $0x78] sm:$0xff] %vm209_vm0, %v2250_v35 }
 0x336   : > { %v1359_v48 = vpop.f32.mrf.mxu1 }
 0x337   : > { %1672 = vst.msk [vmem:[%s3528_s3 + $0x70] sm:$0xff] %vm209_vm0, %v1359_v48 }
 0x33a   : > { %v2269_v44 = vpop.f32.mrf.mxu0 }
 0x33b   : > { %1675 = vst.msk [vmem:[%s3528_s3 + $0x88] sm:$0xff] %vm209_vm0, %v2269_v44 }
 0x33c   : > { %v1458_v24 = vpop.f32.mrf.mxu0  ;;  %v2297_v16 = vpop.f32.mrf.mxu1 }
 0x33d   : > { %1674 = vst.msk [vmem:[%s3528_s3 + $0x80] sm:$0xff] %vm209_vm0, %v1458_v24  ;;  %1683 = vst.msk [vmem:[%s3528_s3 + $0xc8] sm:$0xff] %vm209_vm0, %v2297_v16 }
 0x33e   : > { %v1587_v34 = vpop.f32.mrf.mxu1 }
 0x33f   : > { %1682 = vst.msk [vmem:[%s3528_s3 + $0xc0] sm:$0xff] %vm209_vm0, %v1587_v34 }
 0x342   : > { %v2272_v40 = vpop.f32.mrf.mxu0 }
 0x343   : > { %1677 = vst.msk [vmem:[%s3528_s3 + $0x98] sm:$0xff] %vm209_vm0, %v2272_v40 }
 0x344   : > { %v1468_v28 = vpop.f32.mrf.mxu0  ;;  %v2300_v60 = vpop.f32.mrf.mxu1 }
 0x345   : > { %1676 = vst.msk [vmem:[%s3528_s3 + $0x90] sm:$0xff] %vm209_vm0, %v1468_v28  ;;  %1685 = vst.msk [vmem:[%s3528_s3 + $0xd8] sm:$0xff] %vm209_vm0, %v2300_v60 }
 0x346   : > { %v1597_v47 = vpop.f32.mrf.mxu1 }
 0x347   : > { %1684 = vst.msk [vmem:[%s3528_s3 + $0xd0] sm:$0xff] %vm209_vm0, %v1597_v47 }
 0x34a   : > { %v2275_v32 = vpop.f32.mrf.mxu0 }
 0x34b   : > { %1679 = vst.msk [vmem:[%s3528_s3 + $0xa8] sm:$0xff] %vm209_vm0, %v2275_v32 }
 0x34c   : > { %v1478_v42 = vpop.f32.mrf.mxu0  ;;  %v2303_v18 = vpop.f32.mrf.mxu1 }
 0x34d   : > { %1678 = vst.msk [vmem:[%s3528_s3 + $0xa0] sm:$0xff] %vm209_vm0, %v1478_v42  ;;  %1687 = vst.msk [vmem:[%s3528_s3 + $0xe8] sm:$0xff] %vm209_vm0, %v2303_v18 }
 0x34e   : > { %v1607_v50 = vpop.f32.mrf.mxu1 }
 0x34f   : > { %1686 = vst.msk [vmem:[%s3528_s3 + $0xe0] sm:$0xff] %vm209_vm0, %v1607_v50 }
 0x351   : > { %v2278_v7 = vpop.f32.mrf.mxu0 }
 0x352   : > { %1681 = vst.msk [vmem:[%s3528_s3 + $0xb8] sm:$0xff] %vm209_vm0, %v2278_v7 }
 0x353   : > { %v1488_v17 = vpop.f32.mrf.mxu0  ;;  %v2306_v55 = vpop.f32.mrf.mxu1 }
 0x354   : > { %1680 = vst.msk [vmem:[%s3528_s3 + $0xb0] sm:$0xff] %vm209_vm0, %v1488_v17  ;;  %1689 = vst.msk [vmem:[%s3528_s3 + $0xf8] sm:$0xff] %vm209_vm0, %v2306_v55 }
 0x355   : > { %v1617_v33 = vpop.f32.mrf.mxu1 }
 0x356   : > { %1688 = vst.msk [vmem:[%s3528_s3 + $0xf0] sm:$0xff] %vm209_vm0, %v1617_v33 }
 0x357   : > { %2568 = shalt.err (!%p2565_p0)
}
 0x358   : > { %s2569_s28 = scalar_lea.hbm %s3598_s8, 4096  ;;  %s2573_s24 = scalar_lea.hbm %s3647_s1, 8192 }
 0x359   : > { %p2570_p2 = scmp.ne.s32.totalorder %s3598_s8, %s2569_s28  ;;  %p2574_p3 = scmp.lt.s32.totalorder %s3598_s8, %s3647_s1 }
 0x35a   : > { %p2575_p6 = scmp.lt.s32.totalorder %s2573_s24, %s2569_s28 }
 0x35b   : > { %p2571_p9 = pnand %p2570_p2, %p3657_p12 }
 0x35c   : > { %p2576_p11 = por %p2575_p6, %p2574_p3 }
 0x35d   : > { %p2572_p1 = pneg %p2571_p9 }
 0x35f   : > { %p2577_p13 = pnand %p2576_p11, %p2572_p1 }
 0x361   : > { %2580 = shalt.err (!%p2577_p13)
}
 0x362   : > { %2309 = dma.vmem_to_hbm [thread:$0]  (%p3657_p12), %s3600_s29, 4096, %s3598_s8, %s1691_s14, %s2629_s20, %s2629_s20, %s2630_s30  }
 0x363 PF: > { %s1742_s5 = sand.u32 1, %s2611_s9   ;;  %p3658_p4 = scmp.ne.s32.totalorder %s3654_s22, 0 }
 0x364   : > { %p3659_p5 = scmp.ge.s32.totalorder %s2623_s12, 2  ;;  %s1743_s6 = scalar_lea.sflag [#allocation4], %s1742_s5 }
 0x366   : > { %p2318_p7 = pnand %p3659_p5, %p3658_p4 }
 0x368   : > { %p2319_p8 = pneg %p2318_p7 }
 0x36a   : > { %2602 = dma.done.wait (%p2319_p8), %s1743_s6, 4096  }
 0x36b   : > { %2604 = vsyncadd (%p2319_p8), %s1743_s6, 4294963200  ;;  %s1752_s3 = scalar_lea.sflag [#allocation7], %s1742_s5 }
 0x36c   : > { %2606 = dma.done.wait (%p2319_p8), %s1752_s3, 4096  }
 0x36d   : > { %2608 = vsyncadd (%p2319_p8), %s1752_s3, 4294963200  ;;  %p19_p12 = scmp.ge.s32.totalorder %s2672_s15, 4   ;;  %s3660_s9 = smov %s2615_s10 }
 0x36e   : > { %s3661_s10 = smov %s2619_s11  ;;  %s3662_s11 = smov %s2684_s18 }
 0x36f   : > { %s3663_s12 = smov %s2672_s15  ;;  %21 = sbr.rel (!%p19_p12) target bundleno = 7 (0x7), region = 86 }
 0x374   :  { %1757 = vsyncpa [#allocation3], 1 }
 0x375   :  { %1759 = vsyncpa [#allocation3 + $0x1], 1 }
 0x376   :  { %1760 = vsyncpa [#allocation4], 1 }
 0x377   :  { %1762 = vsyncpa [#allocation4 + $0x1], 1 }
 0x378   :  { %1763 = vsyncpa [#allocation7], 1 }
 0x379   :  { %1765 = vsyncpa [#allocation7 + $0x1], 1 }

</bundles_post_ra>
